<compile_context>
chip_gen: v7x
topology: tpu7x:2x2x1
jax: 0.10.0
libtpu: 0.0.40
codegen_flags: <defaults>
</compile_context>

<pallas_src>
import jax
import jax.numpy as jnp
import numpy as np
from jax.experimental import pallas as pl
from jax.experimental.pallas import tpu as pltpu

# -----------------------------------------------------------------------------
# Scaled-down hyper-parameters (original: FEATURE_WIDTH=1024 from DenseNet,
# DENSE_FEATURE=1024).  The forward pass requires the input feature map to be
# 8x8 spatially: two stride-2 convs give 2x2, and Flatten ->
# Linear(FEATURE_WIDTH, DENSE_FEATURE) only type-checks when
# (FEATURE_WIDTH // 4) * 2 * 2 == FEATURE_WIDTH.
# -----------------------------------------------------------------------------
FEATURE_WIDTH = 64
DENSE_FEATURE = 128
CATE_LEN = 228
CATE_PAD = 256                        # lane-dense (multiple of 128) output width
H = W = 8
C1 = FEATURE_WIDTH // 2               # 32
C2 = FEATURE_WIDTH // 4               # 16
OH1 = OW1 = (H + 2 - 3) // 2 + 1      # 4
OH2 = OW2 = (OH1 + 2 - 3) // 2 + 1    # 2
NPOS1 = OH1 * OW1                     # 16    conv1 output positions
K1 = 9 * FEATURE_WIDTH                # 576   im2col K for conv1
KF = NPOS1 * C1                       # 512   folded conv2 K (= conv1 act size)
FLAT = OH2 * OW2 * C2                 # 64    flatten width (== FEATURE_WIDTH)
NEG_SLOPE = 0.01                      # nn.LeakyReLU default
BN_EPS = 1e-5

# Samples per grid step.  16 -> conv1 M = 256 (fills the 256-wide MXU on
# v6e/v7x, 2x the 128-wide v5e MXU); raise toward 128 for large batches to
# also fill the linear dots.  Keep <= B/2 so v7x's 2 TensorCores both get work.
B_TILE = 16

COMPUTE_DTYPE = jnp.bfloat16          # MXU-native; dots accumulate in f32


def _leaky(v):
    return jnp.where(v >= 0, v, NEG_SLOPE * v)


# -----------------------------------------------------------------------------
# Constant 0/1 gather tensor that folds conv2's 3x3 / stride-2 spatial taps
# (including zero padding) into a dense (KF, FLAT) weight:
#   S[p, kh, kw, q] = 1  iff conv1 position p feeds conv2 output position q
#                         through kernel tap (kh, kw).
# -----------------------------------------------------------------------------
def _build_conv2_gather():
    s = np.zeros((NPOS1, 3, 3, OH2 * OW2), np.float32)
    for q in range(OH2 * OW2):
        oh2, ow2 = divmod(q, OW2)
        for kh in range(3):
            for kw in range(3):
                oh1, ow1 = 2 * oh2 + kh - 1, 2 * ow2 + kw - 1
                if 0 <= oh1 < OH1 and 0 <= ow1 < OW1:
                    s[oh1 * OW1 + ow1, kh, kw, q] = 1.0
    return s


_CONV2_GATHER = _build_conv2_gather()


# -----------------------------------------------------------------------------
# Pallas kernel: one batch tile (B_TILE samples) per grid step, 4 MXU dots.
# -----------------------------------------------------------------------------
def top_half_kernel(p1_ref, w1_ref, sh1_ref, w2_ref, sh2_ref,
                    w3_ref, sh3_ref, w4_ref, out_ref):
    f32 = jnp.float32
    bt = out_ref.shape[0]                       # samples in this grid step
    npos = p1_ref.shape[0]                      # conv1 output positions (16)

    # ---- convlayer 1: Conv(FW->FW/2, 3x3, s2, p1) + BN2d + LeakyReLU
    # One im2col matmul over the whole batch tile (M = npos * bt rows).
    # (npos, bt, K1) -> (npos*bt, K1) is a leading-dim collapse (layout no-op).
    p1 = p1_ref[...].reshape(npos * bt, p1_ref.shape[2])
    a1 = jnp.dot(p1, w1_ref[...], preferred_element_type=f32)
    a1 = _leaky(a1 + sh1_ref[...])              # (npos*bt, C1), rows = (pos, sample)

    # Regroup (pos, sample, C1) -> (sample, pos*C1): 16 static sublane slices
    # + lane concat, done ONCE per batch tile (amortized over bt samples).
    a1_flat = jnp.concatenate(
        [a1[i * bt:(i + 1) * bt, :] for i in range(npos)], axis=-1)  # (bt, KF)

    # ---- convlayer 2: Conv(FW/2->FW/4, 3x3, s2, p1) + BN2d + LeakyReLU
    # Spatial gather + padding + BN scale are folded into w2_ref (KF, FLAT),
    # so conv2 is a single dot; its columns are already in (oh2, ow2, c2)
    # order, i.e. the Flatten layout expected by the permuted linear3 weight.
    a2 = jnp.dot(a1_flat.astype(COMPUTE_DTYPE), w2_ref[...],
                 preferred_element_type=f32)
    a2 = _leaky(a2 + sh2_ref[...])              # (bt, FLAT)

    # ---- Flatten (already done) + Linear(FW, DENSE, bias=False) + BN1d + LeakyReLU
    h = jnp.dot(a2.astype(COMPUTE_DTYPE), w3_ref[...], preferred_element_type=f32)
    h = _leaky(h + sh3_ref[...])                # (bt, DENSE_FEATURE)

    # ---- Dropout (eval: identity) + Linear(DENSE, CATE_LEN, bias=False)
    # TODO(synk): train-mode semantics (BatchNorm batch statistics, stochastic
    # Dropout(p=0.5)) not implemented; eval-mode semantics are used.
    out_ref[...] = jnp.dot(h.astype(COMPUTE_DTYPE), w4_ref[...],
                           preferred_element_type=f32)   # (bt, CATE_PAD)


# -----------------------------------------------------------------------------
# Wrapper: layout plumbing (NCHW->NHWC, conv1 im2col), parameter folding,
#          batch padding to a multiple of B_TILE, lane-padded classifier head.
# -----------------------------------------------------------------------------
@jax.jit
def top_half_forward(x_nchw, params):
    B = x_nchw.shape[0]
    Bp = pl.cdiv(B, B_TILE) * B_TILE
    x = jnp.transpose(x_nchw, (0, 2, 3, 1)).astype(jnp.float32)   # NCHW -> NHWC

    # conv1 im2col (pure layout; the dot runs in the kernel). Columns (kh,kw,cin).
    # TODO(synk): at full scale, avoid materializing the im2col in HBM (2.25x
    # the raw input stream): pass the padded NHWC map and build the 9 taps
    # in-kernel (9 accumulated dots) or use CompilerParams(allow_input_fusion).
    # Matters most on v5e (~820 GB/s HBM).
    xp = jnp.pad(x, ((0, 0), (1, 1), (1, 1), (0, 0)))
    taps = [xp[:, kh:kh + 2 * OH1:2, kw:kw + 2 * OW1:2, :]
            for kh in range(3) for kw in range(3)]
    patches1 = jnp.concatenate(taps, axis=-1).reshape(B, NPOS1, K1)
    patches1 = jnp.transpose(patches1, (1, 0, 2))                 # (NPOS1, B, K1)
    if Bp != B:
        patches1 = jnp.pad(patches1, ((0, 0), (0, Bp - B), (0, 0)))
    patches1 = patches1.astype(COMPUTE_DTYPE)

    # Fold conv bias + BatchNorm scale/shift into the matmul weights (bf16);
    # additive shifts stay f32 (added onto the f32 accumulators).
    w1f = (params["w1"].reshape(K1, C1) * params["s1"]).astype(COMPUTE_DTYPE)
    sh1 = params["b1"] * params["s1"] + params["t1"]              # (1, C1)

    # conv2: fold the static 3x3/stride-2 gather (incl. zero-pad taps) and the
    # BN scale into one (KF, FLAT) weight; shift tiled to (1, FLAT).
    w2s = params["w2"] * params["s2"].reshape(1, 1, 1, C2)        # (3,3,C1,C2)
    w2f = jnp.einsum("pklq,klcd->pcqd", _CONV2_GATHER, w2s)
    w2f = w2f.reshape(KF, FLAT).astype(COMPUTE_DTYPE)             # (512, 64)
    sh2 = jnp.tile(params["b2"] * params["s2"] + params["t2"], (1, OH2 * OW2))

    # Linear3 weight: permute rows from NCHW-flatten order (c, oh, ow) to the
    # kernel's (oh, ow, c) order, then fold the BatchNorm1d scale.
    w3p = jnp.transpose(params["w3_lin"].reshape(C2, OH2, OW2, DENSE_FEATURE),
                        (1, 2, 0, 3)).reshape(FLAT, DENSE_FEATURE)
    w3f = (w3p * params["s3"]).astype(COMPUTE_DTYPE)              # (64, 128)
    sh3 = params["t3"]                                            # (1, 128)
    # Final linear: pad 228 -> 256 output lanes for unmasked lane-dense stores.
    w4p = jnp.pad(params["w4"],
                  ((0, 0), (0, CATE_PAD - CATE_LEN))).astype(COMPUTE_DTYPE)

    flops = 2 * Bp * (NPOS1 * K1 * C1 + KF * FLAT
                      + FLAT * DENSE_FEATURE + DENSE_FEATURE * CATE_PAD)
    bytes_accessed = (2 * (Bp * NPOS1 * K1 + K1 * C1 + KF * FLAT
                           + FLAT * DENSE_FEATURE + DENSE_FEATURE * CATE_PAD)
                      + 4 * (C1 + FLAT + DENSE_FEATURE + Bp * CATE_PAD))

    # TODO(synk): at full scale (FEATURE_WIDTH=1024) tile K1 over a trailing
    # "arbitrary" grid axis with an f32 VMEM accumulator (pl.when init/finalize),
    # raise vmem_limit_bytes, and single-buffer the constant-index weight specs
    # (pipeline_mode=pl.Buffered(1)) so the ~15 MiB bf16 weight residency plus
    # double-buffered patches fits v7x's 64 MiB VMEM.
    out = pl.pallas_call(
        top_half_kernel,
        out_shape=jax.ShapeDtypeStruct((Bp, CATE_PAD), jnp.float32),
        grid=(Bp // B_TILE,),
        in_specs=[
            pl.BlockSpec((NPOS1, B_TILE, K1), lambda b: (0, b, 0)),
            pl.BlockSpec((K1, C1), lambda b: (0, 0)),
            pl.BlockSpec((1, C1), lambda b: (0, 0)),
            pl.BlockSpec((KF, FLAT), lambda b: (0, 0)),
            pl.BlockSpec((1, FLAT), lambda b: (0, 0)),
            pl.BlockSpec((FLAT, DENSE_FEATURE), lambda b: (0, 0)),
            pl.BlockSpec((1, DENSE_FEATURE), lambda b: (0, 0)),
            pl.BlockSpec((DENSE_FEATURE, CATE_PAD), lambda b: (0, 0)),
        ],
        out_specs=pl.BlockSpec((B_TILE, CATE_PAD), lambda b: (b, 0)),
        compiler_params=pltpu.CompilerParams(
            dimension_semantics=("parallel",)),
        cost_estimate=pl.CostEstimate(
            flops=flops, transcendentals=0, bytes_accessed=bytes_accessed),
    )(patches1, w1f, sh1, w2f, sh2, w3f, sh3, w4p)

    return out[:B, :CATE_LEN]


# -----------------------------------------------------------------------------
# Deterministic parameter init (shapes implied by top_half.__init__)
# -----------------------------------------------------------------------------
def _fold_bn(gamma, beta, mean, var):
    scale = gamma / jnp.sqrt(var + BN_EPS)
    shift = beta - mean * scale
    return scale, shift


def init_params(key):
    ks = jax.random.split(key, 16)
    p = {}
    # convlayer 1: Conv2d(FW, FW//2, 3, s2, p1) + BN2d
    p["w1"] = 0.05 * jax.random.normal(ks[0], (3, 3, FEATURE_WIDTH, C1), jnp.float32)
    p["b1"] = 0.05 * jax.random.normal(ks[1], (1, C1), jnp.float32)
    g1 = 1.0 + 0.1 * jax.random.normal(ks[2], (1, C1), jnp.float32)
    be1 = 0.1 * jax.random.normal(ks[3], (1, C1), jnp.float32)
    m1 = 0.1 * jax.random.normal(ks[4], (1, C1), jnp.float32)
    v1 = 1.0 + 0.1 * jnp.abs(jax.random.normal(ks[5], (1, C1), jnp.float32))
    p["s1"], p["t1"] = _fold_bn(g1, be1, m1, v1)
    # convlayer 2: Conv2d(FW//2, FW//4, 3, s2, p1) + BN2d
    p["w2"] = 0.05 * jax.random.normal(ks[6], (3, 3, C1, C2), jnp.float32)
    p["b2"] = 0.05 * jax.random.normal(ks[7], (1, C2), jnp.float32)
    g2 = 1.0 + 0.1 * jax.random.normal(ks[8], (1, C2), jnp.float32)
    be2 = 0.1 * jax.random.normal(ks[9], (1, C2), jnp.float32)
    m2 = 0.1 * jax.random.normal(ks[10], (1, C2), jnp.float32)
    v2 = 1.0 + 0.1 * jnp.abs(jax.random.normal(ks[11], (1, C2), jnp.float32))
    p["s2"], p["t2"] = _fold_bn(g2, be2, m2, v2)
    # Linear(FEATURE_WIDTH, DENSE_FEATURE, bias=False), stored as (in, out).
    p["w3_lin"] = 0.05 * jax.random.normal(
        ks[12], (FEATURE_WIDTH, DENSE_FEATURE), jnp.float32)
    # BatchNorm1d(DENSE_FEATURE) (fresh running stats: mean 0, var 1)
    g3 = 1.0 + 0.1 * jax.random.normal(ks[13], (1, DENSE_FEATURE), jnp.float32)
    be3 = 0.1 * jax.random.normal(ks[14], (1, DENSE_FEATURE), jnp.float32)
    p["s3"], p["t3"] = _fold_bn(g3, be3,
                                jnp.zeros((1, DENSE_FEATURE), jnp.float32),
                                jnp.ones((1, DENSE_FEATURE), jnp.float32))
    # Linear(DENSE_FEATURE, CATE_LEN, bias=False)
    p["w4"] = 0.05 * jax.random.normal(ks[15], (DENSE_FEATURE, CATE_LEN), jnp.float32)
    return p


# -----------------------------------------------------------------------------
# NumPy float64 reference (PyTorch semantics, eval mode)
# -----------------------------------------------------------------------------
def reference_forward_np(x_nchw, params):
    p = {k: np.asarray(v, np.float64) for k, v in params.items()}
    x = np.transpose(np.asarray(x_nchw, np.float64), (0, 2, 3, 1))  # NHWC

    def leaky(v):
        return np.where(v >= 0, v, NEG_SLOPE * v)

    def convlayer(x, w, b, s, t):  # x NHWC, w HWIO; 3x3 stride 2 pad 1
        B, Hi, Wi, Ci = x.shape
        Ho, Wo = (Hi + 2 - 3) // 2 + 1, (Wi + 2 - 3) // 2 + 1
        xp = np.zeros((B, Hi + 2, Wi + 2, Ci), np.float64)
        xp[:, 1:-1, 1:-1, :] = x
        y = np.zeros((B, Ho, Wo, w.shape[-1]), np.float64)
        for oh in range(Ho):
            for ow in range(Wo):
                patch = xp[:, 2 * oh:2 * oh + 3, 2 * ow:2 * ow + 3, :]
                y[:, oh, ow, :] = np.einsum("bhwc,hwco->bo", patch, w)
        y = y + b.reshape(1, 1, 1, -1)
        y = y * s.reshape(1, 1, 1, -1) + t.reshape(1, 1, 1, -1)
        return leaky(y)

    h = convlayer(x, p["w1"], p["b1"], p["s1"], p["t1"])
    h = convlayer(h, p["w2"], p["b2"], p["s2"], p["t2"])
    h = np.transpose(h, (0, 3, 1, 2)).reshape(h.shape[0], -1)   # NCHW Flatten
    h = h @ p["w3_lin"]
    h = leaky(h * p["s3"] + p["t3"])
    # Dropout(p=0.5) -> identity in eval mode
    return h @ p["w4"]


if __name__ == "__main__":
    key = jax.random.PRNGKey(0)
    pkey, xkey = jax.random.split(key)
    params = init_params(pkey)
    # Input feature map, NCHW like the PyTorch module expects: (B, FW, 8, 8).
    # B=32 -> 2 grid steps of B_TILE=16 samples (exercises the batch tiling
    # and gives both v7x TensorCores a parallel step).
    B = 32
    x = jax.random.normal(xkey, (B, FEATURE_WIDTH, H, W), jnp.float32)

    out = jax.block_until_ready(top_half_forward(x, params))
    assert out.shape == (B, CATE_LEN) and out.dtype == jnp.float32

    ref = reference_forward_np(x, params)
    out64 = np.asarray(out, np.float64)
    # bf16 inputs/weights with f32 accumulation: compare with a bf16-sized
    # mixed abs/rel tolerance (the old 1e-3 absolute check was f32-only).
    tol = 3e-2 + 3e-2 * np.abs(ref)
    max_diff = float(np.max(np.abs(out64 - ref)))
    if not np.isfinite(out64).all() or not np.all(np.abs(out64 - ref) <= tol):
        raise AssertionError(f"kernel/reference mismatch, max abs diff={max_diff}")

    print("KERNEL_OK")
</pallas_src>

<mosaic_0001>
module attributes {stable_mosaic.version = 11 : i64} {
  func.func @top_half_kernel(%arg0: i32, %arg1: memref<16x16x576xbf16, #tpu.memory_space<vmem>>, %arg2: memref<576x32xbf16, #tpu.memory_space<vmem>>, %arg3: memref<1x32xf32, #tpu.memory_space<vmem>>, %arg4: memref<512x64xbf16, #tpu.memory_space<vmem>>, %arg5: memref<1x64xf32, #tpu.memory_space<vmem>>, %arg6: memref<64x128xbf16, #tpu.memory_space<vmem>>, %arg7: memref<1x128xf32, #tpu.memory_space<vmem>>, %arg8: memref<128x256xbf16, #tpu.memory_space<vmem>>, %arg9: memref<16x256xf32, #tpu.memory_space<vmem>>) attributes {dimension_semantics = [#tpu.dimension_semantics<parallel>], iteration_bounds = array<i64: 2>, scalar_prefetch = 0 : i64, scratch_operands = 0 : i64, tpu.core_type = #tpu.core_type<tc>, window_params = [{transform_indices = @transform_0, window_bounds = array<i64: 16, 16, 576>}, {pipeline_mode = #tpu.pipeline_mode<synchronous>, transform_indices = @transform_1, window_bounds = array<i64: 576, 32>}, {pipeline_mode = #tpu.pipeline_mode<synchronous>, transform_indices = @transform_2, window_bounds = array<i64: 1, 32>}, {pipeline_mode = #tpu.pipeline_mode<synchronous>, transform_indices = @transform_3, window_bounds = array<i64: 512, 64>}, {pipeline_mode = #tpu.pipeline_mode<synchronous>, transform_indices = @transform_4, window_bounds = array<i64: 1, 64>}, {pipeline_mode = #tpu.pipeline_mode<synchronous>, transform_indices = @transform_5, window_bounds = array<i64: 64, 128>}, {pipeline_mode = #tpu.pipeline_mode<synchronous>, transform_indices = @transform_6, window_bounds = array<i64: 1, 128>}, {pipeline_mode = #tpu.pipeline_mode<synchronous>, transform_indices = @transform_7, window_bounds = array<i64: 128, 256>}, {transform_indices = @transform_8, window_bounds = array<i64: 16, 256>}]} {
    %c0 = arith.constant 0 : index
    %c0_0 = arith.constant 0 : index
    %c0_1 = arith.constant 0 : index
    %0 = vector.load %arg1[%c0, %c0_0, %c0_1] : memref<16x16x576xbf16, #tpu.memory_space<vmem>>, vector<16x16x576xbf16>
    %1 = vector.shape_cast %0 : vector<16x16x576xbf16> to vector<256x576xbf16>
    %c0_2 = arith.constant 0 : index
    %c0_3 = arith.constant 0 : index
    %2 = vector.load %arg2[%c0_2, %c0_3] : memref<576x32xbf16, #tpu.memory_space<vmem>>, vector<576x32xbf16>
    %cst = arith.constant dense<0.000000e+00> : vector<256x32xf32>
    %3 = tpu.matmul %1, %2, %cst {dimension_numbers = #tpu.dot_dimension_numbers<[1], [0], [0], [1], [0, 0, 1, 1], [], []>} : vector<256x576xbf16>, vector<576x32xbf16>, vector<256x32xf32> -> vector<256x32xf32>
    %c0_4 = arith.constant 0 : index
    %c0_5 = arith.constant 0 : index
    %4 = vector.load %arg3[%c0_4, %c0_5] : memref<1x32xf32, #tpu.memory_space<vmem>>, vector<1x32xf32>
    %5 = vector.broadcast %4 : vector<1x32xf32> to vector<256x32xf32>
    %6 = arith.addf %3, %5 : vector<256x32xf32>
    %cst_6 = arith.constant 0.000000e+00 : f32
    %7 = vector.broadcast %cst_6 : f32 to vector<256x32xf32>
    %8 = arith.cmpf oge, %6, %7 : vector<256x32xf32>
    %cst_7 = arith.constant 0.00999999977 : f32
    %9 = vector.broadcast %cst_7 : f32 to vector<256x32xf32>
    %10 = arith.mulf %9, %6 : vector<256x32xf32>
    %11 = arith.select %8, %6, %10 : vector<256x32xi1>, vector<256x32xf32>
    %12 = vector.extract_strided_slice %11 {offsets = [0, 0], sizes = [16, 32], strides = [1, 1]} : vector<256x32xf32> to vector<16x32xf32>
    %13 = vector.extract_strided_slice %11 {offsets = [16, 0], sizes = [16, 32], strides = [1, 1]} : vector<256x32xf32> to vector<16x32xf32>
    %14 = vector.extract_strided_slice %11 {offsets = [32, 0], sizes = [16, 32], strides = [1, 1]} : vector<256x32xf32> to vector<16x32xf32>
    %15 = vector.extract_strided_slice %11 {offsets = [48, 0], sizes = [16, 32], strides = [1, 1]} : vector<256x32xf32> to vector<16x32xf32>
    %16 = vector.extract_strided_slice %11 {offsets = [64, 0], sizes = [16, 32], strides = [1, 1]} : vector<256x32xf32> to vector<16x32xf32>
    %17 = vector.extract_strided_slice %11 {offsets = [80, 0], sizes = [16, 32], strides = [1, 1]} : vector<256x32xf32> to vector<16x32xf32>
    %18 = vector.extract_strided_slice %11 {offsets = [96, 0], sizes = [16, 32], strides = [1, 1]} : vector<256x32xf32> to vector<16x32xf32>
    %19 = vector.extract_strided_slice %11 {offsets = [112, 0], sizes = [16, 32], strides = [1, 1]} : vector<256x32xf32> to vector<16x32xf32>
    %20 = vector.extract_strided_slice %11 {offsets = [128, 0], sizes = [16, 32], strides = [1, 1]} : vector<256x32xf32> to vector<16x32xf32>
    %21 = vector.extract_strided_slice %11 {offsets = [144, 0], sizes = [16, 32], strides = [1, 1]} : vector<256x32xf32> to vector<16x32xf32>
    %22 = vector.extract_strided_slice %11 {offsets = [160, 0], sizes = [16, 32], strides = [1, 1]} : vector<256x32xf32> to vector<16x32xf32>
    %23 = vector.extract_strided_slice %11 {offsets = [176, 0], sizes = [16, 32], strides = [1, 1]} : vector<256x32xf32> to vector<16x32xf32>
    %24 = vector.extract_strided_slice %11 {offsets = [192, 0], sizes = [16, 32], strides = [1, 1]} : vector<256x32xf32> to vector<16x32xf32>
    %25 = vector.extract_strided_slice %11 {offsets = [208, 0], sizes = [16, 32], strides = [1, 1]} : vector<256x32xf32> to vector<16x32xf32>
    %26 = vector.extract_strided_slice %11 {offsets = [224, 0], sizes = [16, 32], strides = [1, 1]} : vector<256x32xf32> to vector<16x32xf32>
    %27 = vector.extract_strided_slice %11 {offsets = [240, 0], sizes = [16, 32], strides = [1, 1]} : vector<256x32xf32> to vector<16x32xf32>
    %28 = tpu.concatenate %12, %13, %14, %15, %16, %17, %18, %19, %20, %21, %22, %23, %24, %25, %26, %27 in 1 : vector<16x32xf32>, vector<16x32xf32>, vector<16x32xf32>, vector<16x32xf32>, vector<16x32xf32>, vector<16x32xf32>, vector<16x32xf32>, vector<16x32xf32>, vector<16x32xf32>, vector<16x32xf32>, vector<16x32xf32>, vector<16x32xf32>, vector<16x32xf32>, vector<16x32xf32>, vector<16x32xf32>, vector<16x32xf32> -> vector<16x512xf32>
    %29 = arith.truncf %28 : vector<16x512xf32> to vector<16x512xbf16>
    %c0_8 = arith.constant 0 : index
    %c0_9 = arith.constant 0 : index
    %30 = vector.load %arg4[%c0_8, %c0_9] : memref<512x64xbf16, #tpu.memory_space<vmem>>, vector<512x64xbf16>
    %cst_10 = arith.constant dense<0.000000e+00> : vector<16x64xf32>
    %31 = tpu.matmul %29, %30, %cst_10 {dimension_numbers = #tpu.dot_dimension_numbers<[1], [0], [0], [1], [0, 0, 1, 1], [], []>} : vector<16x512xbf16>, vector<512x64xbf16>, vector<16x64xf32> -> vector<16x64xf32>
    %c0_11 = arith.constant 0 : index
    %c0_12 = arith.constant 0 : index
    %32 = vector.load %arg5[%c0_11, %c0_12] : memref<1x64xf32, #tpu.memory_space<vmem>>, vector<1x64xf32>
    %33 = vector.broadcast %32 : vector<1x64xf32> to vector<16x64xf32>
    %34 = arith.addf %31, %33 : vector<16x64xf32>
    %cst_13 = arith.constant 0.000000e+00 : f32
    %35 = vector.broadcast %cst_13 : f32 to vector<16x64xf32>
    %36 = arith.cmpf oge, %34, %35 : vector<16x64xf32>
    %cst_14 = arith.constant 0.00999999977 : f32
    %37 = vector.broadcast %cst_14 : f32 to vector<16x64xf32>
    %38 = arith.mulf %37, %34 : vector<16x64xf32>
    %39 = arith.select %36, %34, %38 : vector<16x64xi1>, vector<16x64xf32>
    %40 = arith.truncf %39 : vector<16x64xf32> to vector<16x64xbf16>
    %c0_15 = arith.constant 0 : index
    %c0_16 = arith.constant 0 : index
    %41 = vector.load %arg6[%c0_15, %c0_16] : memref<64x128xbf16, #tpu.memory_space<vmem>>, vector<64x128xbf16>
    %cst_17 = arith.constant dense<0.000000e+00> : vector<16x128xf32>
    %42 = tpu.matmul %40, %41, %cst_17 {dimension_numbers = #tpu.dot_dimension_numbers<[1], [0], [0], [1], [0, 0, 1, 1], [], []>} : vector<16x64xbf16>, vector<64x128xbf16>, vector<16x128xf32> -> vector<16x128xf32>
    %c0_18 = arith.constant 0 : index
    %c0_19 = arith.constant 0 : index
    %43 = vector.load %arg7[%c0_18, %c0_19] : memref<1x128xf32, #tpu.memory_space<vmem>>, vector<1x128xf32>
    %44 = vector.broadcast %43 : vector<1x128xf32> to vector<16x128xf32>
    %45 = arith.addf %42, %44 : vector<16x128xf32>
    %cst_20 = arith.constant 0.000000e+00 : f32
    %46 = vector.broadcast %cst_20 : f32 to vector<16x128xf32>
    %47 = arith.cmpf oge, %45, %46 : vector<16x128xf32>
    %cst_21 = arith.constant 0.00999999977 : f32
    %48 = vector.broadcast %cst_21 : f32 to vector<16x128xf32>
    %49 = arith.mulf %48, %45 : vector<16x128xf32>
    %50 = arith.select %47, %45, %49 : vector<16x128xi1>, vector<16x128xf32>
    %51 = arith.truncf %50 : vector<16x128xf32> to vector<16x128xbf16>
    %c0_22 = arith.constant 0 : index
    %c0_23 = arith.constant 0 : index
    %52 = vector.load %arg8[%c0_22, %c0_23] : memref<128x256xbf16, #tpu.memory_space<vmem>>, vector<128x256xbf16>
    %cst_24 = arith.constant dense<0.000000e+00> : vector<16x256xf32>
    %53 = tpu.matmul %51, %52, %cst_24 {dimension_numbers = #tpu.dot_dimension_numbers<[1], [0], [0], [1], [0, 0, 1, 1], [], []>} : vector<16x128xbf16>, vector<128x256xbf16>, vector<16x256xf32> -> vector<16x256xf32>
    %c0_25 = arith.constant 0 : index
    %c0_26 = arith.constant 0 : index
    %54 = vector.load %arg9[%c0_25, %c0_26] : memref<16x256xf32, #tpu.memory_space<vmem>>, vector<16x256xf32>
    tpu.vector_store %arg9[%c0_25, %c0_26], %53 {strides = array<i32>} : memref<16x256xf32, #tpu.memory_space<vmem>>, vector<16x256xf32>,
    return
  }
  func.func @transform_0(%arg0: i32) -> (i32, i32, i32) {
    %c0_i32 = arith.constant 0 : i32
    %c0_i32_0 = arith.constant 0 : i32
    %c0_i32_1 = arith.constant 0 : i32
    return %c0_i32, %arg0, %c0_i32_0 : i32, i32, i32
  }
  func.func @transform_1(%arg0: i32) -> (i32, i32) {
    %c0_i32 = arith.constant 0 : i32
    %c0_i32_0 = arith.constant 0 : i32
    %c0_i32_1 = arith.constant 0 : i32
    return %c0_i32, %c0_i32_0 : i32, i32
  }
  func.func @transform_2(%arg0: i32) -> (i32, i32) {
    %c0_i32 = arith.constant 0 : i32
    %c0_i32_0 = arith.constant 0 : i32
    %c0_i32_1 = arith.constant 0 : i32
    return %c0_i32, %c0_i32_0 : i32, i32
  }
  func.func @transform_3(%arg0: i32) -> (i32, i32) {
    %c0_i32 = arith.constant 0 : i32
    %c0_i32_0 = arith.constant 0 : i32
    %c0_i32_1 = arith.constant 0 : i32
    return %c0_i32, %c0_i32_0 : i32, i32
  }
  func.func @transform_4(%arg0: i32) -> (i32, i32) {
    %c0_i32 = arith.constant 0 : i32
    %c0_i32_0 = arith.constant 0 : i32
    %c0_i32_1 = arith.constant 0 : i32
    return %c0_i32, %c0_i32_0 : i32, i32
  }
  func.func @transform_5(%arg0: i32) -> (i32, i32) {
    %c0_i32 = arith.constant 0 : i32
    %c0_i32_0 = arith.constant 0 : i32
    %c0_i32_1 = arith.constant 0 : i32
    return %c0_i32, %c0_i32_0 : i32, i32
  }
  func.func @transform_6(%arg0: i32) -> (i32, i32) {
    %c0_i32 = arith.constant 0 : i32
    %c0_i32_0 = arith.constant 0 : i32
    %c0_i32_1 = arith.constant 0 : i32
    return %c0_i32, %c0_i32_0 : i32, i32
  }
  func.func @transform_7(%arg0: i32) -> (i32, i32) {
    %c0_i32 = arith.constant 0 : i32
    %c0_i32_0 = arith.constant 0 : i32
    %c0_i32_1 = arith.constant 0 : i32
    return %c0_i32, %c0_i32_0 : i32, i32
  }
  func.func @transform_8(%arg0: i32) -> (i32, i32) {
    %c0_i32 = arith.constant 0 : i32
    %c0_i32_0 = arith.constant 0 : i32
    return %arg0, %c0_i32 : i32, i32
  }
}

</mosaic_0001>

<bundles_post_ra>
// kernel: top_half_forward.1
= control target key start
LH: loop header
LB: loop body
LE: loop exit
PB: predicated region body
PF: predicated region fallthrough
CT: control target
= control target key end

     0   :  { %13 = vsyncpa [#allocation4], 0  ;;  %s4689_s0 = inlined_call_operand.vmem [shape: bf16[16,32,576], index: 0, kind: input, shape index: {}]   ;;  %s4690_s1 = inlined_call_operand.vmem [shape: bf16[576,32], index: 1, kind: input, shape index: {}]   ;;  %s4691_s2 = inlined_call_operand.vmem [shape: f32[1,32], index: 2, kind: input, shape index: {}]   ;;  %s4692_s3 = inlined_call_operand.vmem [shape: bf16[512,64], index: 3, kind: input, shape index: {}]   ;;  %s4693_s4 = inlined_call_operand.vmem [shape: f32[1,64], index: 4, kind: input, shape index: {}]   ;;  %s4694_s5 = inlined_call_operand.vmem [shape: bf16[64,128], index: 5, kind: input, shape index: {}]   ;;  %s4695_s6 = inlined_call_operand.vmem [shape: f32[1,128], index: 6, kind: input, shape index: {}]   ;;  %s4696_s7 = inlined_call_operand.vmem [shape: bf16[128,256], index: 7, kind: input, shape index: {}]   ;;  %s4697_s8 = inlined_call_operand.hbm [shape: f32[32,256], index: 8, kind: output, shape index: {}]  }
   0x1   :  { %15 = vsyncpa [#allocation4 + $0x1], 0  ;;  %s3793_s27 = smov 0   ;;  %s3795_s28 = smov 0  }
   0x2   :  { %s3797_s29 = smov 0   ;;  %s3799_s30 = smov 0  }
   0x3 LB: > { %s2743_s9 = sadd.s32 4294967295, %s3737_s30   ;;  %s2744_s10 = sadd.s32 4294967294, %s3737_s30   ;;  %s3737_s30 = sphi %s3799_s30, %s4703_s30   ;;  %s3733_s29 = sphi %s3797_s29, %s4702_s29   ;;  %s3729_s28 = sphi %s3795_s28, %s4701_s28   ;;  %s3725_s27 = sphi %s3793_s27, %s4700_s27  }
   0x4   : > { %s3816_s11 = sadd.s32 1, %s3737_s30   ;;  %s28_s12 = sadd.s32 1, %s3733_s29 }
   0x5   : > { %s25_s13 = ssub.s32 %s3737_s30, %s3816_s11  ;;  %p35_p0 = scmp.ne.s32.totalorder %s3733_s29, %s3729_s28 }
   0x6   : > { %p26_p1 = scmp.eq.s32.totalorder %s25_s13, 0  ;;  %p36_p2 = scmp.eq.s32.totalorder %s3737_s30, 0 }
   0x7   : > { %p212_p3 = scmp.eq.s32.totalorder %s2743_s9, 1  ;;  %p217_p4 = scmp.ne.s32.totalorder %s3729_s28, %s3725_s27 }
   0x8   : > { %s3829_s14 = scalar_select %p26_p1, %s3733_s29, %s28_s12  }
   0x9   : > { %p37_p5 = por %p36_p2, %p35_p0  ;;  %p3831_p6 = por %p212_p3, %p35_p0 }
   0xa   : > { %p218_p7 = scmp.eq.s32.totalorder %s2744_s10, 1  ;;  %p2746_p9 = scmp.ge.s32.totalorder %s3737_s30, 2 }
   0xc   : > { %p3835_p8 = por %p218_p7, %p217_p4  ;;  %255 = sbr.rel (%p2746_p9) target bundleno = 77 (0x4d), region = 44 }
  0x13   : > { %258 = sbr.rel (!%p37_p5) target bundleno = 77 (0x4d), region = 48  ;;  %s260_s17 = sand.u32 (%p37_p5), 1, %s3733_s29  }
  0x14   : > { %s3358_s18 = smul.u32 (%p37_p5), 40, %s3737_s30 }
  0x15   : > { %s3357_s19 = smul.u32 (%p37_p5), 640, %s260_s17 }
  0x16   : > { %s3847_s22 = scalar_lea.vmem (%p37_p5), %s4689_s0, %s3358_s18 }
  0x17   : > { %v281_v0 = vld [vmem:[%s3847_s22] sm:$0xff] (%p37_p5)  ;;  %v283_v1 = vld [vmem:[%s3847_s22 + $0x8] sm:$0xff] (%p37_p5)  ;;  %v285_v2 = vld [vmem:[%s3847_s22 + $0x14] sm:$0xff] (%p37_p5)  ;;  %s3852_s23 = scalar_lea.vmem (%p37_p5), [#allocation2], %s3357_s19 }
  0x18   : > { %282 = vst [vmem:[%s3852_s23] sm:$0xff] (%p37_p5), %v281_v0  ;;  %284 = vst [vmem:[%s3852_s23 + $0x8] sm:$0xff] (%p37_p5), %v283_v1  ;;  %v287_v3 = vld [vmem:[%s3847_s22 + $0x1c] sm:$0xff] (%p37_p5)  ;;  %v289_v4 = vld [vmem:[%s3847_s22 + $0x50] sm:$0xff] (%p37_p5) }
  0x19   : > { %286 = vst [vmem:[%s3852_s23 + $0x14] sm:$0xff] (%p37_p5), %v285_v2  ;;  %v291_v5 = vld [vmem:[%s3847_s22 + $0x58] sm:$0xff] (%p37_p5)  ;;  %288 = vst [vmem:[%s3852_s23 + $0x1c] sm:$0xff] (%p37_p5), %v287_v3  ;;  %v293_v6 = vld [vmem:[%s3847_s22 + $0x64] sm:$0xff] (%p37_p5) }
  0x1a   : > { %290 = vst [vmem:[%s3852_s23 + $0x28] sm:$0xff] %v289_v4  ;;  %292 = vst [vmem:[%s3852_s23 + $0x30] sm:$0xff] %v291_v5  ;;  %v295_v7 = vld [vmem:[%s3847_s22 + $0x6c] sm:$0xff]  ;;  %v297_v8 = vld [vmem:[%s3847_s22 + $0xa0] sm:$0xff] }
  0x1b   : > { %294 = vst [vmem:[%s3852_s23 + $0x3c] sm:$0xff] %v293_v6  ;;  %296 = vst [vmem:[%s3852_s23 + $0x44] sm:$0xff] %v295_v7  ;;  %v299_v9 = vld [vmem:[%s3847_s22 + $0xa8] sm:$0xff]  ;;  %v301_v10 = vld [vmem:[%s3847_s22 + $0xb4] sm:$0xff] }
  0x1c   : > { %298 = vst [vmem:[%s3852_s23 + $0x50] sm:$0xff] %v297_v8  ;;  %v303_v11 = vld [vmem:[%s3847_s22 + $0xbc] sm:$0xff]  ;;  %300 = vst [vmem:[%s3852_s23 + $0x58] sm:$0xff] %v299_v9  ;;  %v305_v12 = vld [vmem:[%s3847_s22 + $0xf0] sm:$0xff] }
  0x1d   : > { %302 = vst [vmem:[%s3852_s23 + $0x64] sm:$0xff] %v301_v10  ;;  %304 = vst [vmem:[%s3852_s23 + $0x6c] sm:$0xff] %v303_v11  ;;  %v307_v13 = vld [vmem:[%s3847_s22 + $0xf8] sm:$0xff]  ;;  %v309_v14 = vld [vmem:[%s3847_s22 + $0x104] sm:$0xff] }
  0x1e   : > { %306 = vst [vmem:[%s3852_s23 + $0x78] sm:$0xff] %v305_v12  ;;  %308 = vst [vmem:[%s3852_s23 + $0x80] sm:$0xff] %v307_v13  ;;  %v311_v15 = vld [vmem:[%s3847_s22 + $0x10c] sm:$0xff]  ;;  %v313_v16 = vld [vmem:[%s3847_s22 + $0x140] sm:$0xff] }
  0x1f   : > { %310 = vst [vmem:[%s3852_s23 + $0x8c] sm:$0xff] %v309_v14  ;;  %v315_v17 = vld [vmem:[%s3847_s22 + $0x148] sm:$0xff]  ;;  %312 = vst [vmem:[%s3852_s23 + $0x94] sm:$0xff] %v311_v15  ;;  %v317_v18 = vld [vmem:[%s3847_s22 + $0x154] sm:$0xff] }
  0x20   : > { %314 = vst [vmem:[%s3852_s23 + $0xa0] sm:$0xff] %v313_v16  ;;  %316 = vst [vmem:[%s3852_s23 + $0xa8] sm:$0xff] %v315_v17  ;;  %v319_v19 = vld [vmem:[%s3847_s22 + $0x15c] sm:$0xff]  ;;  %v321_v20 = vld [vmem:[%s3847_s22 + $0x190] sm:$0xff] }
  0x21   : > { %318 = vst [vmem:[%s3852_s23 + $0xb4] sm:$0xff] %v317_v18  ;;  %320 = vst [vmem:[%s3852_s23 + $0xbc] sm:$0xff] %v319_v19  ;;  %v323_v21 = vld [vmem:[%s3847_s22 + $0x198] sm:$0xff]  ;;  %v325_v22 = vld [vmem:[%s3847_s22 + $0x1a4] sm:$0xff] }
  0x22   : > { %322 = vst [vmem:[%s3852_s23 + $0xc8] sm:$0xff] %v321_v20  ;;  %v327_v23 = vld [vmem:[%s3847_s22 + $0x1ac] sm:$0xff]  ;;  %324 = vst [vmem:[%s3852_s23 + $0xd0] sm:$0xff] %v323_v21  ;;  %v329_v24 = vld [vmem:[%s3847_s22 + $0x1e0] sm:$0xff] }
  0x23   : > { %326 = vst [vmem:[%s3852_s23 + $0xdc] sm:$0xff] %v325_v22  ;;  %328 = vst [vmem:[%s3852_s23 + $0xe4] sm:$0xff] %v327_v23  ;;  %v331_v25 = vld [vmem:[%s3847_s22 + $0x1e8] sm:$0xff]  ;;  %v333_v26 = vld [vmem:[%s3847_s22 + $0x1f4] sm:$0xff] }
  0x24   : > { %330 = vst [vmem:[%s3852_s23 + $0xf0] sm:$0xff] %v329_v24  ;;  %332 = vst [vmem:[%s3852_s23 + $0xf8] sm:$0xff] %v331_v25  ;;  %v335_v27 = vld [vmem:[%s3847_s22 + $0x1fc] sm:$0xff]  ;;  %v337_v28 = vld [vmem:[%s3847_s22 + $0x230] sm:$0xff] }
  0x25   : > { %334 = vst [vmem:[%s3852_s23 + $0x104] sm:$0xff] %v333_v26  ;;  %v339_v29 = vld [vmem:[%s3847_s22 + $0x238] sm:$0xff]  ;;  %336 = vst [vmem:[%s3852_s23 + $0x10c] sm:$0xff] %v335_v27  ;;  %v341_v30 = vld [vmem:[%s3847_s22 + $0x244] sm:$0xff] }
  0x26   : > { %338 = vst [vmem:[%s3852_s23 + $0x118] sm:$0xff] %v337_v28  ;;  %340 = vst [vmem:[%s3852_s23 + $0x120] sm:$0xff] %v339_v29  ;;  %v343_v31 = vld [vmem:[%s3847_s22 + $0x24c] sm:$0xff]  ;;  %v345_v32 = vld [vmem:[%s3847_s22 + $0x280] sm:$0xff] }
  0x27   : > { %342 = vst [vmem:[%s3852_s23 + $0x12c] sm:$0xff] %v341_v30  ;;  %344 = vst [vmem:[%s3852_s23 + $0x134] sm:$0xff] %v343_v31  ;;  %v347_v33 = vld [vmem:[%s3847_s22 + $0x288] sm:$0xff]  ;;  %v349_v34 = vld [vmem:[%s3847_s22 + $0x294] sm:$0xff] }
  0x28   : > { %346 = vst [vmem:[%s3852_s23 + $0x140] sm:$0xff] %v345_v32  ;;  %v351_v35 = vld [vmem:[%s3847_s22 + $0x29c] sm:$0xff]  ;;  %348 = vst [vmem:[%s3852_s23 + $0x148] sm:$0xff] %v347_v33  ;;  %v353_v36 = vld [vmem:[%s3847_s22 + $0x2d0] sm:$0xff] }
  0x29   : > { %350 = vst [vmem:[%s3852_s23 + $0x154] sm:$0xff] %v349_v34  ;;  %352 = vst [vmem:[%s3852_s23 + $0x15c] sm:$0xff] %v351_v35  ;;  %v355_v37 = vld [vmem:[%s3847_s22 + $0x2d8] sm:$0xff]  ;;  %v357_v38 = vld [vmem:[%s3847_s22 + $0x2e4] sm:$0xff] }
  0x2a   : > { %354 = vst [vmem:[%s3852_s23 + $0x168] sm:$0xff] %v353_v36  ;;  %356 = vst [vmem:[%s3852_s23 + $0x170] sm:$0xff] %v355_v37  ;;  %v359_v39 = vld [vmem:[%s3847_s22 + $0x2ec] sm:$0xff]  ;;  %v361_v40 = vld [vmem:[%s3847_s22 + $0x320] sm:$0xff] }
  0x2b   : > { %358 = vst [vmem:[%s3852_s23 + $0x17c] sm:$0xff] %v357_v38  ;;  %v363_v41 = vld [vmem:[%s3847_s22 + $0x328] sm:$0xff]  ;;  %360 = vst [vmem:[%s3852_s23 + $0x184] sm:$0xff] %v359_v39  ;;  %v365_v42 = vld [vmem:[%s3847_s22 + $0x334] sm:$0xff] }
  0x2c   : > { %362 = vst [vmem:[%s3852_s23 + $0x190] sm:$0xff] %v361_v40  ;;  %364 = vst [vmem:[%s3852_s23 + $0x198] sm:$0xff] %v363_v41  ;;  %v367_v43 = vld [vmem:[%s3847_s22 + $0x33c] sm:$0xff]  ;;  %v369_v44 = vld [vmem:[%s3847_s22 + $0x370] sm:$0xff] }
  0x2d   : > { %366 = vst [vmem:[%s3852_s23 + $0x1a4] sm:$0xff] %v365_v42  ;;  %368 = vst [vmem:[%s3852_s23 + $0x1ac] sm:$0xff] %v367_v43  ;;  %v371_v45 = vld [vmem:[%s3847_s22 + $0x378] sm:$0xff]  ;;  %v373_v46 = vld [vmem:[%s3847_s22 + $0x384] sm:$0xff] }
  0x2e   : > { %370 = vst [vmem:[%s3852_s23 + $0x1b8] sm:$0xff] %v369_v44  ;;  %v375_v47 = vld [vmem:[%s3847_s22 + $0x38c] sm:$0xff]  ;;  %372 = vst [vmem:[%s3852_s23 + $0x1c0] sm:$0xff] %v371_v45  ;;  %v377_v48 = vld [vmem:[%s3847_s22 + $0x3c0] sm:$0xff] }
  0x2f   : > { %374 = vst [vmem:[%s3852_s23 + $0x1cc] sm:$0xff] %v373_v46  ;;  %376 = vst [vmem:[%s3852_s23 + $0x1d4] sm:$0xff] %v375_v47  ;;  %v379_v49 = vld [vmem:[%s3847_s22 + $0x3c8] sm:$0xff]  ;;  %v381_v50 = vld [vmem:[%s3847_s22 + $0x3d4] sm:$0xff] }
  0x30   : > { %378 = vst [vmem:[%s3852_s23 + $0x1e0] sm:$0xff] %v377_v48  ;;  %380 = vst [vmem:[%s3852_s23 + $0x1e8] sm:$0xff] %v379_v49  ;;  %v383_v51 = vld [vmem:[%s3847_s22 + $0x3dc] sm:$0xff]  ;;  %v385_v52 = vld [vmem:[%s3847_s22 + $0x410] sm:$0xff] }
  0x31   : > { %382 = vst [vmem:[%s3852_s23 + $0x1f4] sm:$0xff] %v381_v50  ;;  %v387_v53 = vld [vmem:[%s3847_s22 + $0x418] sm:$0xff]  ;;  %384 = vst [vmem:[%s3852_s23 + $0x1fc] sm:$0xff] %v383_v51  ;;  %v389_v54 = vld [vmem:[%s3847_s22 + $0x424] sm:$0xff] }
  0x32   : > { %386 = vst [vmem:[%s3852_s23 + $0x208] sm:$0xff] %v385_v52  ;;  %388 = vst [vmem:[%s3852_s23 + $0x210] sm:$0xff] %v387_v53  ;;  %v391_v55 = vld [vmem:[%s3847_s22 + $0x42c] sm:$0xff]  ;;  %v393_v56 = vld [vmem:[%s3847_s22 + $0x460] sm:$0xff] }
  0x33   : > { %390 = vst [vmem:[%s3852_s23 + $0x21c] sm:$0xff] %v389_v54  ;;  %392 = vst [vmem:[%s3852_s23 + $0x224] sm:$0xff] %v391_v55  ;;  %v395_v57 = vld [vmem:[%s3847_s22 + $0x468] sm:$0xff]  ;;  %v397_v58 = vld [vmem:[%s3847_s22 + $0x474] sm:$0xff] }
  0x34   : > { %394 = vst [vmem:[%s3852_s23 + $0x230] sm:$0xff] %v393_v56  ;;  %v399_v59 = vld [vmem:[%s3847_s22 + $0x47c] sm:$0xff]  ;;  %396 = vst [vmem:[%s3852_s23 + $0x238] sm:$0xff] %v395_v57  ;;  %v401_v60 = vld [vmem:[%s3847_s22 + $0x4b0] sm:$0xff] }
  0x35   : > { %398 = vst [vmem:[%s3852_s23 + $0x244] sm:$0xff] %v397_v58  ;;  %400 = vst [vmem:[%s3852_s23 + $0x24c] sm:$0xff] %v399_v59  ;;  %v403_v61 = vld [vmem:[%s3847_s22 + $0x4b8] sm:$0xff]  ;;  %v405_v62 = vld [vmem:[%s3847_s22 + $0x4c4] sm:$0xff] }
  0x36   : > { %402 = vst [vmem:[%s3852_s23 + $0x258] sm:$0xff] %v401_v60  ;;  %404 = vst [vmem:[%s3852_s23 + $0x260] sm:$0xff] %v403_v61  ;;  %v407_v63 = vld [vmem:[%s3847_s22 + $0x4cc] sm:$0xff]  ;;  %v2752_v1 = vld [vmem:[%s3847_s22 + $0x24] sm:$0xf] }
  0x37   : > { %406 = vst [vmem:[%s3852_s23 + $0x26c] sm:$0xff] %v405_v62  ;;  %v2750_v0 = vld [vmem:[%s3847_s22 + $0x10] sm:$0xf]  ;;  %408 = vst [vmem:[%s3852_s23 + $0x274] sm:$0xff] %v407_v63  ;;  %v2754_v2 = vld [vmem:[%s3847_s22 + $0x60] sm:$0xf] }
  0x38   : > { %2751 = vst [vmem:[%s3852_s23 + $0x10] sm:$0xf] %v2750_v0  ;;  %2753 = vst [vmem:[%s3852_s23 + $0x24] sm:$0xf] %v2752_v1  ;;  %v2756_v3 = vld [vmem:[%s3847_s22 + $0x74] sm:$0xf] }
  0x39   : > { %v2758_v4 = vld [vmem:[%s3847_s22 + $0xb0] sm:$0xf]  ;;  %2755 = vst [vmem:[%s3852_s23 + $0x38] sm:$0xf] %v2754_v2  ;;  %2757 = vst [vmem:[%s3852_s23 + $0x4c] sm:$0xf] %v2756_v3 }
  0x3a   : > { %2759 = vst [vmem:[%s3852_s23 + $0x60] sm:$0xf] %v2758_v4  ;;  %v2760_v5 = vld [vmem:[%s3847_s22 + $0xc4] sm:$0xf]  ;;  %v2762_v6 = vld [vmem:[%s3847_s22 + $0x100] sm:$0xf] }
  0x3b   : > { %v2764_v7 = vld [vmem:[%s3847_s22 + $0x114] sm:$0xf]  ;;  %2761 = vst [vmem:[%s3852_s23 + $0x74] sm:$0xf] %v2760_v5  ;;  %2763 = vst [vmem:[%s3852_s23 + $0x88] sm:$0xf] %v2762_v6 }
  0x3c   : > { %2765 = vst [vmem:[%s3852_s23 + $0x9c] sm:$0xf] %v2764_v7  ;;  %v2766_v8 = vld [vmem:[%s3847_s22 + $0x150] sm:$0xf]  ;;  %v2768_v9 = vld [vmem:[%s3847_s22 + $0x164] sm:$0xf] }
  0x3d   : > { %v2770_v10 = vld [vmem:[%s3847_s22 + $0x1a0] sm:$0xf]  ;;  %2767 = vst [vmem:[%s3852_s23 + $0xb0] sm:$0xf] %v2766_v8  ;;  %2769 = vst [vmem:[%s3852_s23 + $0xc4] sm:$0xf] %v2768_v9 }
  0x3e   : > { %2771 = vst [vmem:[%s3852_s23 + $0xd8] sm:$0xf] %v2770_v10  ;;  %v2772_v11 = vld [vmem:[%s3847_s22 + $0x1b4] sm:$0xf]  ;;  %v2774_v12 = vld [vmem:[%s3847_s22 + $0x1f0] sm:$0xf] }
  0x3f   : > { %v2776_v13 = vld [vmem:[%s3847_s22 + $0x204] sm:$0xf]  ;;  %2773 = vst [vmem:[%s3852_s23 + $0xec] sm:$0xf] %v2772_v11  ;;  %2775 = vst [vmem:[%s3852_s23 + $0x100] sm:$0xf] %v2774_v12 }
  0x40   : > { %2777 = vst [vmem:[%s3852_s23 + $0x114] sm:$0xf] %v2776_v13  ;;  %v2778_v14 = vld [vmem:[%s3847_s22 + $0x240] sm:$0xf]  ;;  %v2780_v15 = vld [vmem:[%s3847_s22 + $0x254] sm:$0xf] }
  0x41   : > { %v2782_v16 = vld [vmem:[%s3847_s22 + $0x290] sm:$0xf]  ;;  %2779 = vst [vmem:[%s3852_s23 + $0x128] sm:$0xf] %v2778_v14  ;;  %2781 = vst [vmem:[%s3852_s23 + $0x13c] sm:$0xf] %v2780_v15 }
  0x42   : > { %2783 = vst [vmem:[%s3852_s23 + $0x150] sm:$0xf] %v2782_v16  ;;  %v2784_v17 = vld [vmem:[%s3847_s22 + $0x2a4] sm:$0xf]  ;;  %v2786_v18 = vld [vmem:[%s3847_s22 + $0x2e0] sm:$0xf] }
  0x43   : > { %v2788_v19 = vld [vmem:[%s3847_s22 + $0x2f4] sm:$0xf]  ;;  %2785 = vst [vmem:[%s3852_s23 + $0x164] sm:$0xf] %v2784_v17  ;;  %2787 = vst [vmem:[%s3852_s23 + $0x178] sm:$0xf] %v2786_v18 }
  0x44   : > { %2789 = vst [vmem:[%s3852_s23 + $0x18c] sm:$0xf] %v2788_v19  ;;  %v2790_v20 = vld [vmem:[%s3847_s22 + $0x330] sm:$0xf]  ;;  %v2792_v21 = vld [vmem:[%s3847_s22 + $0x344] sm:$0xf] }
  0x45   : > { %v2794_v22 = vld [vmem:[%s3847_s22 + $0x380] sm:$0xf]  ;;  %2791 = vst [vmem:[%s3852_s23 + $0x1a0] sm:$0xf] %v2790_v20  ;;  %2793 = vst [vmem:[%s3852_s23 + $0x1b4] sm:$0xf] %v2792_v21 }
  0x46   : > { %2795 = vst [vmem:[%s3852_s23 + $0x1c8] sm:$0xf] %v2794_v22  ;;  %v2796_v23 = vld [vmem:[%s3847_s22 + $0x394] sm:$0xf]  ;;  %v2798_v24 = vld [vmem:[%s3847_s22 + $0x3d0] sm:$0xf] }
  0x47   : > { %v2800_v25 = vld [vmem:[%s3847_s22 + $0x3e4] sm:$0xf]  ;;  %2797 = vst [vmem:[%s3852_s23 + $0x1dc] sm:$0xf] %v2796_v23  ;;  %2799 = vst [vmem:[%s3852_s23 + $0x1f0] sm:$0xf] %v2798_v24 }
  0x48   : > { %2801 = vst [vmem:[%s3852_s23 + $0x204] sm:$0xf] %v2800_v25  ;;  %v2802_v26 = vld [vmem:[%s3847_s22 + $0x420] sm:$0xf]  ;;  %v2804_v27 = vld [vmem:[%s3847_s22 + $0x434] sm:$0xf] }
  0x49   : > { %v2806_v28 = vld [vmem:[%s3847_s22 + $0x470] sm:$0xf]  ;;  %2803 = vst [vmem:[%s3852_s23 + $0x218] sm:$0xf] %v2802_v26  ;;  %2805 = vst [vmem:[%s3852_s23 + $0x22c] sm:$0xf] %v2804_v27 }
  0x4a   : > { %2807 = vst [vmem:[%s3852_s23 + $0x240] sm:$0xf] %v2806_v28  ;;  %v2808_v29 = vld [vmem:[%s3847_s22 + $0x484] sm:$0xf]  ;;  %v2810_v30 = vld [vmem:[%s3847_s22 + $0x4c0] sm:$0xf] }
  0x4b   : > { %v2812_v31 = vld [vmem:[%s3847_s22 + $0x4d4] sm:$0xf]  ;;  %2809 = vst [vmem:[%s3852_s23 + $0x254] sm:$0xf] %v2808_v29  ;;  %2811 = vst [vmem:[%s3852_s23 + $0x268] sm:$0xf] %v2810_v30 }
  0x4c   : > { %2813 = vst [vmem:[%s3852_s23 + $0x27c] sm:$0xf] %v2812_v31 }
  0x4d PF: > { %p2814_p10 = scmp.ge.s32.totalorder %s3737_s30, 1  ;;  %p484_p11 = scmp.lt.s32.totalorder %s3737_s30, 3 }
  0x4f   : > { %p485_p12 = pnand %p2814_p10, %p484_p11 }
  0x50   : > { %v3467_v32 = vld [vmem:[%s4690_s1 + $0x40] sm:$0xff] (!%p485_p12)   ;;  %v3471_v36 = vld [vmem:[%s4690_s1 + $0x48] sm:$0xff] (!%p485_p12)   ;;  %v3475_v40 = vld [vmem:[%s4690_s1 + $0x50] sm:$0xff] (!%p485_p12)   ;;  %s4112_s13 = sand.u32 (!%p485_p12), 1, %s3729_s28   ;;  %vm1318_vm0 = vcmask (!%p485_p12), 523264   ;;  %s3740_s22 = smov (!%p485_p12), 64  }
  0x51   : > { %488 = sbr.rel (%p485_p12) target bundleno = 1319 (0x527), region = 74  ;;  %v3468_v33 = vld [vmem:[%s4690_s1] sm:$0xff] (!%p485_p12)   ;;  %3012 = vmatprep.subr.bf16.mxu0 (!%p485_p12), %v3467_v32  ;;  %v3472_v37 = vld [vmem:[%s4690_s1 + $0x8] sm:$0xff] (!%p485_p12)   ;;  %v3476_v41 = vld [vmem:[%s4690_s1 + $0x10] sm:$0xff] (!%p485_p12)   ;;  %s2815_s17 = sshll.u32 (!%p485_p12), %s4112_s13, 5 }
  0x52   : > { %v3469_v34 = vld [vmem:[%s4690_s1 + $0xc0] sm:$0xff] (!%p485_p12)   ;;  %3013 = vmatpush3.bf16.msra.mxu0 (!%p485_p12), %v3468_v33  ;;  %v3473_v38 = vld [vmem:[%s4690_s1 + $0xc8] sm:$0xff] (!%p485_p12)   ;;  %v3477_v42 = vld [vmem:[%s4690_s1 + $0xd0] sm:$0xff] (!%p485_p12)   ;;  %s3359_s23 = smul.u32 (!%p485_p12), 640, %s4112_s13  ;;  %s3011_s19 = sshll.u32 (!%p485_p12), %s2743_s9, 9 }
  0x53   : > { %v3470_v35 = vld [vmem:[%s4690_s1 + $0x80] sm:$0xff] (!%p485_p12)   ;;  %3124 = vmatprep.subr.bf16.mxu1 (!%p485_p12), %v3469_v34  ;;  %3014 = vmatprep.subr.bf16.mxu0 (!%p485_p12), %v3471_v36  ;;  %v3474_v39 = vld [vmem:[%s4690_s1 + $0x88] sm:$0xff] (!%p485_p12)   ;;  %v3478_v43 = vld [vmem:[%s4690_s1 + $0x90] sm:$0xff] (!%p485_p12)   ;;  %s2658_s24 = scalar_lea.sflag (!%p485_p12), [#allocation4], %s4112_s13  ;;  %s3745_s26 = smov (!%p485_p12), [#allocation3]  }
  0x54   : > { %3125 = vmatpush3.bf16.msra.mxu1 (!%p485_p12), %v3470_v35  ;;  %v3479_v44 = vld [vmem:[%s4690_s1 + $0x58] sm:$0xff] (!%p485_p12)   ;;  %v3483_v48 = vld [vmem:[%s4690_s1 + $0x60] sm:$0xff] (!%p485_p12)   ;;  %v3487_v52 = vld [vmem:[%s4690_s1 + $0x68] sm:$0xff] (!%p485_p12)   ;;  %s4142_s25 = scalar_lea.vmem (!%p485_p12), [#allocation2], %s3359_s23  ;;  %s3739_s23 = smov (!%p485_p12), 32  }
  0x55   : > { %3126 = vmatprep.subr.bf16.mxu1 (!%p485_p12), %v3473_v38  ;;  %v3480_v45 = vld [vmem:[%s4690_s1 + $0x18] sm:$0xff] (!%p485_p12)   ;;  %v3484_v49 = vld [vmem:[%s4690_s1 + $0x20] sm:$0xff] (!%p485_p12)   ;;  %v3488_v53 = vld [vmem:[%s4690_s1 + $0x28] sm:$0xff] (!%p485_p12)  }
  0x56   : > { %3015 = vmatpush3.bf16.msra.mxu0 (!%p485_p12), %v3472_v37  ;;  %v3481_v46 = vld [vmem:[%s4690_s1 + $0xd8] sm:$0xff] (!%p485_p12)   ;;  %v3485_v50 = vld [vmem:[%s4690_s1 + $0xe0] sm:$0xff] (!%p485_p12)   ;;  %v3489_v54 = vld [vmem:[%s4690_s1 + $0xe8] sm:$0xff] (!%p485_p12)  }
  0x57   : > { %3016 = vmatprep.subr.bf16.mxu0 (!%p485_p12), %v3475_v40  ;;  %v3482_v47 = vld [vmem:[%s4690_s1 + $0x98] sm:$0xff] (!%p485_p12)   ;;  %v3486_v51 = vld [vmem:[%s4690_s1 + $0xa0] sm:$0xff] (!%p485_p12)   ;;  %v3490_v55 = vld [vmem:[%s4690_s1 + $0xa8] sm:$0xff] (!%p485_p12)  }
  0x58   : > { %3127 = vmatpush3.bf16.msra.mxu1 %v3474_v39  ;;  %v3491_v56 = vld [vmem:[%s4690_s1 + $0x70] sm:$0xff]   ;;  %v3495_v60 = vld [vmem:[%s4690_s1 + $0x78] sm:$0xff]   ;;  %v3502_v2 = vld [vmem:[%s4690_s1 + $0x100] sm:$0xff]  }
  0x59   : > { %3128 = vmatprep.subr.bf16.mxu1 %v3477_v42  ;;  %v3492_v57 = vld [vmem:[%s4690_s1 + $0x30] sm:$0xff]   ;;  %v3496_v61 = vld [vmem:[%s4690_s1 + $0x38] sm:$0xff]   ;;  %v3505_v4 = vld [vmem:[%s4142_s25 + $0xc] ss:$20 sps:$4 sm:$0xff]  }
  0x5a   : > { %3017 = vmatpush3.bf16.msra.mxu0 %v3476_v41  ;;  %v3493_v58 = vld [vmem:[%s4690_s1 + $0xf0] sm:$0xff]   ;;  %v3497_v62 = vld [vmem:[%s4690_s1 + $0xf8] sm:$0xff]   ;;  %v3506_v5 = vld [vmem:[%s4142_s25 + $0x2c] ss:$20 sps:$4 sm:$0xff]   ;;  %1560 = vmatprep.mubr.bf16.mxu1 %v3505_v4 }
  0x5b   : > { %3018 = vmatprep.subr.bf16.mxu0 %v3479_v44  ;;  %v3494_v59 = vld [vmem:[%s4690_s1 + $0xb0] sm:$0xff]   ;;  %v3500_v0 = vld [vmem:[%s4142_s25 + $0x4] ss:$20 sps:$4 sm:$0xff]   ;;  %v3503_v3 = vld [vmem:[%s4142_s25 + $0x8] ss:$20 sps:$4 sm:$0xff]  }
  0x5c   : > { %3129 = vmatpush3.bf16.msra.mxu1 %v3478_v43  ;;  %v3498_v63 = vld [vmem:[%s4142_s25] ss:$20 sps:$4 sm:$0xff]   ;;  %v3501_v1 = vld [vmem:[%s4690_s1 + $0xb8] sm:$0xff]   ;;  %1399 = vmatprep.mubr.bf16.mxu0 %v3500_v0  ;;  %v3511_v9 = vld [vmem:[%s4142_s25 + $0x30] ss:$20 sps:$4 sm:$0xff]  }
  0x5d   : > { %3130 = vmatprep.subr.bf16.mxu1 %v3481_v46  ;;  %v3509_v6 = vld [vmem:[%s4142_s25 + $0x34] ss:$20 sps:$4 sm:$0xff]   ;;  %v3515_v10 = vld [vmem:[%s4142_s25 + $0x5c] ss:$20 sps:$4 sm:$0xff]   ;;  %v3517_v14 = vld [vmem:[%s4142_s25 + $0x58] ss:$20 sps:$4 sm:$0xff]  }
  0x5e   : > { %3019 = vmatpush3.bf16.msra.mxu0 %v3480_v45  ;;  %v3508_v7 = vld [vmem:[%s4142_s25 + $0x28] ss:$20 sps:$4 sm:$0xff]   ;;  %v3514_v12 = vld [vmem:[%s4142_s25 + $0x50] ss:$20 sps:$4 sm:$0xff]   ;;  %v3520_v16 = vld [vmem:[%s4142_s25 + $0x78] ss:$20 sps:$4 sm:$0xff]  }
  0x5f   : > { %3020 = vmatprep.subr.bf16.mxu0 %v3483_v48  ;;  %v3512_v8 = vld [vmem:[%s4142_s25 + $0x54] ss:$20 sps:$4 sm:$0xff]   ;;  %v3518_v13 = vld [vmem:[%s4142_s25 + $0x7c] ss:$20 sps:$4 sm:$0xff]   ;;  %v3521_v15 = vld [vmem:[%s4142_s25 + $0x84] ss:$20 sps:$4 sm:$0xff]  }
  0x60   : > { %3131 = vmatpush3.bf16.msra.mxu1 %v3482_v47  ;;  %v3527_v11 = vld [vmem:[%s4690_s1 + $0x108] sm:$0xff]   ;;  %v3524_v17 = vld [vmem:[%s4142_s25 + $0xa4] ss:$20 sps:$4 sm:$0xff]   ;;  %v3552_v18 = vld [vmem:[%s4690_s1 + $0x110] sm:$0xff]  }
  0x61   : > { %3132 = vmatprep.subr.bf16.mxu1 %v3485_v50  ;;  %v3523_v19 = vld [vmem:[%s4142_s25 + $0x80] ss:$20 sps:$4 sm:$0xff]   ;;  %v3530_v23 = vld [vmem:[%s4142_s25 + $0xa8] ss:$20 sps:$4 sm:$0xff]   ;;  %v3536_v28 = vld [vmem:[%s4142_s25 + $0xd0] ss:$20 sps:$4 sm:$0xff]  }
  0x62   : > { %3021 = vmatpush3.bf16.msra.mxu0 %v3484_v49  ;;  %v3528_v20 = vld [vmem:[%s4142_s25 + $0xac] ss:$20 sps:$4 sm:$0xff]   ;;  %v3534_v24 = vld [vmem:[%s4142_s25 + $0xd4] ss:$20 sps:$4 sm:$0xff]   ;;  %v3577_v25 = vld [vmem:[%s4690_s1 + $0x118] sm:$0xff]  }
  0x63   : > { %3022 = vmatprep.subr.bf16.mxu0 %v3487_v52  ;;  %v3526_v21 = vld [vmem:[%s4142_s25 + $0xa0] ss:$20 sps:$4 sm:$0xff]   ;;  %v3533_v26 = vld [vmem:[%s4142_s25 + $0xc8] ss:$20 sps:$4 sm:$0xff]   ;;  %v3539_v30 = vld [vmem:[%s4142_s25 + $0xf0] ss:$20 sps:$4 sm:$0xff]  }
  0x64   : > { %3133 = vmatpush3.bf16.msra.mxu1 %v3486_v51  ;;  %v3531_v22 = vld [vmem:[%s4142_s25 + $0xcc] ss:$20 sps:$4 sm:$0xff]   ;;  %v3537_v27 = vld [vmem:[%s4142_s25 + $0xf4] ss:$20 sps:$4 sm:$0xff]   ;;  %v3540_v29 = vld [vmem:[%s4142_s25 + $0xfc] ss:$20 sps:$4 sm:$0xff]  }
  0x65   : > { %3134 = vmatprep.subr.bf16.mxu1 %v3489_v54  ;;  %v3543_v31 = vld [vmem:[%s4142_s25 + $0x11c] ss:$20 sps:$4 sm:$0xff]   ;;  %v3542_v32 = vld [vmem:[%s4142_s25 + $0xf8] ss:$20 sps:$4 sm:$0xff]   ;;  %v3548_v36 = vld [vmem:[%s4142_s25 + $0x120] ss:$20 sps:$4 sm:$0xff]  }
  0x66   : > { %3023 = vmatpush3.bf16.msra.mxu0 %v3488_v53  ;;  %v3546_v33 = vld [vmem:[%s4142_s25 + $0x124] ss:$20 sps:$4 sm:$0xff]   ;;  %v3553_v37 = vld [vmem:[%s4142_s25 + $0x14c] ss:$20 sps:$4 sm:$0xff]   ;;  %v3555_v40 = vld [vmem:[%s4142_s25 + $0x148] ss:$20 sps:$4 sm:$0xff]  }
  0x67   : > { %3024 = vmatprep.subr.bf16.mxu0 %v3491_v56  ;;  %v3545_v34 = vld [vmem:[%s4142_s25 + $0x118] ss:$20 sps:$4 sm:$0xff]   ;;  %v3551_v38 = vld [vmem:[%s4142_s25 + $0x140] ss:$20 sps:$4 sm:$0xff]   ;;  %v3558_v42 = vld [vmem:[%s4142_s25 + $0x168] ss:$20 sps:$4 sm:$0xff]  }
  0x68   : > { %3135 = vmatpush3.bf16.msra.mxu1 %v3490_v55  ;;  %v3549_v35 = vld [vmem:[%s4142_s25 + $0x144] ss:$20 sps:$4 sm:$0xff]   ;;  %v3556_v39 = vld [vmem:[%s4142_s25 + $0x16c] ss:$20 sps:$4 sm:$0xff]   ;;  %v3559_v41 = vld [vmem:[%s4142_s25 + $0x174] ss:$20 sps:$4 sm:$0xff]  }
  0x69   : > { %3136 = vmatprep.subr.bf16.mxu1 %v3493_v58  ;;  %v3562_v43 = vld [vmem:[%s4142_s25 + $0x194] ss:$20 sps:$4 sm:$0xff]   ;;  %v3561_v44 = vld [vmem:[%s4142_s25 + $0x170] ss:$20 sps:$4 sm:$0xff]   ;;  %v3567_v48 = vld [vmem:[%s4142_s25 + $0x198] ss:$20 sps:$4 sm:$0xff]  }
  0x6a   : > { %3025 = vmatpush3.bf16.msra.mxu0 %v3492_v57  ;;  %v3565_v45 = vld [vmem:[%s4142_s25 + $0x19c] ss:$20 sps:$4 sm:$0xff]   ;;  %v3571_v49 = vld [vmem:[%s4142_s25 + $0x1c4] ss:$20 sps:$4 sm:$0xff]   ;;  %v3573_v52 = vld [vmem:[%s4142_s25 + $0x1c0] ss:$20 sps:$4 sm:$0xff]  }
  0x6b   : > { %3026 = vmatprep.subr.bf16.mxu0 %v3495_v60  ;;  %v3564_v46 = vld [vmem:[%s4142_s25 + $0x190] ss:$20 sps:$4 sm:$0xff]   ;;  %v3570_v50 = vld [vmem:[%s4142_s25 + $0x1b8] ss:$20 sps:$4 sm:$0xff]   ;;  %v3576_v54 = vld [vmem:[%s4142_s25 + $0x1e0] ss:$20 sps:$4 sm:$0xff]  }
  0x6c   : > { %3137 = vmatpush3.bf16.msra.mxu1 %v3494_v59  ;;  %v3568_v47 = vld [vmem:[%s4142_s25 + $0x1bc] ss:$20 sps:$4 sm:$0xff]   ;;  %v3574_v51 = vld [vmem:[%s4142_s25 + $0x1e4] ss:$20 sps:$4 sm:$0xff]   ;;  %v3578_v53 = vld [vmem:[%s4142_s25 + $0x1ec] ss:$20 sps:$4 sm:$0xff]  }
  0x6d   : > { %3138 = vmatprep.subr.bf16.mxu1 %v3497_v62  ;;  %v3581_v55 = vld [vmem:[%s4142_s25 + $0x20c] ss:$20 sps:$4 sm:$0xff]   ;;  %v3580_v56 = vld [vmem:[%s4142_s25 + $0x1e8] ss:$20 sps:$4 sm:$0xff]   ;;  %v3586_v60 = vld [vmem:[%s4142_s25 + $0x210] ss:$20 sps:$4 sm:$0xff]  }
  0x6e   : > { %3027 = vmatpush3.bf16.msra.mxu0 %v3496_v61  ;;  %v3584_v57 = vld [vmem:[%s4142_s25 + $0x214] ss:$20 sps:$4 sm:$0xff]   ;;  %v3590_v61 = vld [vmem:[%s4142_s25 + $0x23c] ss:$20 sps:$4 sm:$0xff]   ;;  %v3592_v0 = vld [vmem:[%s4142_s25 + $0x238] ss:$20 sps:$4 sm:$0xff]  }
  0x6f   : > { %3305 = vmatprep.subr.bf16.mxu0 %v3502_v2  ;;  %v3583_v58 = vld [vmem:[%s4142_s25 + $0x208] ss:$20 sps:$4 sm:$0xff]   ;;  %v3589_v62 = vld [vmem:[%s4142_s25 + $0x230] ss:$20 sps:$4 sm:$0xff]   ;;  %v3598_v4 = vld [vmem:[%s4142_s25 + $0x260] ss:$20 sps:$4 sm:$0xff]  }
  0x70   : > { %3139 = vmatpush3.bf16.msra.mxu1 %v3501_v1  ;;  %v3587_v59 = vld [vmem:[%s4142_s25 + $0x234] ss:$20 sps:$4 sm:$0xff]   ;;  %v3596_v1 = vld [vmem:[%s4142_s25 + $0x264] ss:$20 sps:$4 sm:$0xff]  }
  0x71   : > { %1400 = vmatmul.mubr.bf16.vlgmr.msra.gmra.mrb[0].mxu0 %v3498_v63  ;;  %v3593_v63 = vld [vmem:[%s4142_s25 + $0x25c] ss:$20 sps:$4 sm:$0xff]  }
  0x72   : > { %3306 = vmatpush3.bf16.msra.mxu0 %v3502_v2  ;;  %1407 = vmatprep.mubr.bf16.mxu0 %v3506_v5  ;;  %v3595_v2 = vld [vmem:[%s4142_s25 + $0x258] ss:$20 sps:$4 sm:$0xff]  }
  0x73   : > { %1561 = vmatmul.mubr.bf16.vlgmr.msra.gmra.mrb[0].mxu1 %v3503_v3  ;;  %3307 = vmatprep.subr.bf16.mxu0 %v3527_v11  ;;  %v3599_v3 = vld [vmem:[%s4142_s25 + $0x10] ss:$20 sps:$4 sm:$0xff]   ;;  %v3600_v5 = vld [vmem:[%s4142_s25 + $0x38] ss:$20 sps:$4 sm:$0xff]  }
  0x74   : > { %1568 = vmatprep.mubr.bf16.mxu1 %v3509_v6  ;;  %v3601_v6 = vld [vmem:[%s4142_s25 + $0x60] ss:$20 sps:$4 sm:$0xff]  }
  0x76   : > { %3308 = vmatpush3.bf16.msra.mxu0 %v3527_v11  ;;  %v3606_v11 = vld [vmem:[%s4142_s25 + $0x128] ss:$20 sps:$4 sm:$0xff]  }
  0x77   : > { %3309 = vmatprep.subr.bf16.mxu0 %v3552_v18 }
  0x79   : > { %1408 = vmatmul.mubr.bf16.gmra.mrb[4].mxu0 %v3508_v7  ;;  %v3602_v7 = vld [vmem:[%s4142_s25 + $0x88] ss:$20 sps:$4 sm:$0xff]  }
  0x7a   : > { %1415 = vmatprep.mubr.bf16.mxu0 %v3512_v8  ;;  %3310 = vmatpush3.bf16.msra.mxu0 %v3552_v18  ;;  %v3603_v8 = vld [vmem:[%s4142_s25 + $0xb0] ss:$20 sps:$4 sm:$0xff]   ;;  %v3613_v18 = vld [vmem:[%s4142_s25 + $0x240] ss:$20 sps:$4 sm:$0xff]  }
  0x7b   : > { %1569 = vmatmul.mubr.bf16.gmra.mrb[4].mxu1 %v3511_v9  ;;  %3311 = vmatprep.subr.bf16.mxu0 %v3577_v25  ;;  %v3604_v9 = vld [vmem:[%s4142_s25 + $0xd8] ss:$20 sps:$4 sm:$0xff]  }
  0x7c   : > { %1576 = vmatprep.mubr.bf16.mxu1 %v3515_v10  ;;  %v3605_v10 = vld [vmem:[%s4142_s25 + $0x100] ss:$20 sps:$4 sm:$0xff]  }
  0x7e   : > { %3312 = vmatpush3.bf16.msra.mxu0 %v3577_v25 }
  0x81   : > { %1416 = vmatmul.mubr.bf16.gmra.mrb[8].mxu0 %v3514_v12  ;;  %v3607_v12 = vld [vmem:[%s4142_s25 + $0x150] ss:$20 sps:$4 sm:$0xff]  }
  0x82   : > { %1423 = vmatprep.mubr.bf16.mxu0 %v3518_v13  ;;  %v3608_v13 = vld [vmem:[%s4142_s25 + $0x178] ss:$20 sps:$4 sm:$0xff]  }
  0x83   : > { %1577 = vmatmul.mubr.bf16.gmra.mrb[8].mxu1 %v3517_v14  ;;  %v3609_v14 = vld [vmem:[%s4142_s25 + $0x1a0] ss:$20 sps:$4 sm:$0xff]  }
  0x84   : > { %1584 = vmatprep.mubr.bf16.mxu1 %v3521_v15  ;;  %v3610_v15 = vld [vmem:[%s4142_s25 + $0x1c8] ss:$20 sps:$4 sm:$0xff]  }
  0x89   : > { %1424 = vmatmul.mubr.bf16.gmra.mrb[12].mxu0 %v3520_v16  ;;  %v3611_v16 = vld [vmem:[%s4142_s25 + $0x1f0] ss:$20 sps:$4 sm:$0xff]  }
  0x8a   : > { %1431 = vmatprep.mubr.bf16.mxu0 %v3524_v17  ;;  %v3612_v17 = vld [vmem:[%s4142_s25 + $0x218] ss:$20 sps:$4 sm:$0xff]  }
  0x8b   : > { %1585 = vmatmul.mubr.bf16.gmra.mrb[12].mxu1 %v3523_v19  ;;  %v3614_v19 = vld [vmem:[%s4142_s25 + $0x268] ss:$20 sps:$4 sm:$0xff]   ;;  %s3741_s25 = smov 96  }
  0x8c   : > { %1592 = vmatprep.mubr.bf16.mxu1 %v3528_v20 }
  0x91   : > { %1432 = vmatmul.mubr.bf16.gmra.mrb[16].mxu0 %v3526_v21  ;;  %v4258_v21 = vld [vmem:[%s4691_s2] ss:$0 sm:$0xff] }
  0x92   : > { %1439 = vmatprep.mubr.bf16.mxu0 %v3531_v22 }
  0x93   : > { %1593 = vmatmul.mubr.bf16.gmra.mrb[16].mxu1 %v3530_v23 }
  0x94   : > { %1600 = vmatprep.mubr.bf16.mxu1 %v3534_v24 }
  0x99   : > { %1440 = vmatmul.mubr.bf16.gmra.mrb[20].mxu0 %v3533_v26 }
  0x9a   : > { %1447 = vmatprep.mubr.bf16.mxu0 %v3537_v27 }
  0x9b   : > { %1601 = vmatmul.mubr.bf16.gmra.mrb[20].mxu1 %v3536_v28 }
  0x9c   : > { %1608 = vmatprep.mubr.bf16.mxu1 %v3540_v29 }
  0xa1   : > { %1448 = vmatmul.mubr.bf16.gmra.mrb[24].mxu0 %v3539_v30 }
  0xa2   : > { %1455 = vmatprep.mubr.bf16.mxu0 %v3543_v31 }
  0xa3   : > { %1609 = vmatmul.mubr.bf16.gmra.mrb[24].mxu1 %v3542_v32 }
  0xa4   : > { %1616 = vmatprep.mubr.bf16.mxu1 %v3546_v33 }
  0xa9   : > { %1456 = vmatmul.mubr.bf16.gmra.mrb[28].mxu0 %v3545_v34 }
  0xaa   : > { %1463 = vmatprep.mubr.bf16.mxu0 %v3549_v35 }
  0xab   : > { %1617 = vmatmul.mubr.bf16.gmra.mrb[28].mxu1 %v3548_v36 }
  0xac   : > { %1624 = vmatprep.mubr.bf16.mxu1 %v3553_v37 }
  0xb1   : > { %1464 = vmatmul.mubr.bf16.gmra.mrb[32].mxu0 %v3551_v38 }
  0xb2   : > { %1471 = vmatprep.mubr.bf16.mxu0 %v3556_v39 }
  0xb3   : > { %1625 = vmatmul.mubr.bf16.gmra.mrb[32].mxu1 %v3555_v40 }
  0xb4   : > { %1632 = vmatprep.mubr.bf16.mxu1 %v3559_v41 }
  0xb9   : > { %1472 = vmatmul.mubr.bf16.gmra.mrb[36].mxu0 %v3558_v42 }
  0xba   : > { %1479 = vmatprep.mubr.bf16.mxu0 %v3562_v43 }
  0xbb   : > { %1633 = vmatmul.mubr.bf16.gmra.mrb[36].mxu1 %v3561_v44 }
  0xbc   : > { %1640 = vmatprep.mubr.bf16.mxu1 %v3565_v45 }
  0xc1   : > { %1480 = vmatmul.mubr.bf16.gmra.mrb[40].mxu0 %v3564_v46 }
  0xc2   : > { %1487 = vmatprep.mubr.bf16.mxu0 %v3568_v47 }
  0xc3   : > { %1641 = vmatmul.mubr.bf16.gmra.mrb[40].mxu1 %v3567_v48 }
  0xc4   : > { %1648 = vmatprep.mubr.bf16.mxu1 %v3571_v49 }
  0xc9   : > { %1488 = vmatmul.mubr.bf16.gmra.mrb[44].mxu0 %v3570_v50 }
  0xca   : > { %1495 = vmatprep.mubr.bf16.mxu0 %v3574_v51 }
  0xcb   : > { %1649 = vmatmul.mubr.bf16.gmra.mrb[44].mxu1 %v3573_v52 }
  0xcc   : > { %1656 = vmatprep.mubr.bf16.mxu1 %v3578_v53 }
  0xd1   : > { %1496 = vmatmul.mubr.bf16.gmra.mrb[48].mxu0 %v3576_v54 }
  0xd2   : > { %1503 = vmatprep.mubr.bf16.mxu0 %v3581_v55 }
  0xd3   : > { %1657 = vmatmul.mubr.bf16.gmra.mrb[48].mxu1 %v3580_v56 }
  0xd4   : > { %1664 = vmatprep.mubr.bf16.mxu1 %v3584_v57 }
  0xd9   : > { %1504 = vmatmul.mubr.bf16.gmra.mrb[52].mxu0 %v3583_v58 }
  0xda   : > { %1511 = vmatprep.mubr.bf16.mxu0 %v3587_v59 }
  0xdb   : > { %1665 = vmatmul.mubr.bf16.gmra.mrb[52].mxu1 %v3586_v60 }
  0xdc   : > { %1672 = vmatprep.mubr.bf16.mxu1 %v3590_v61 }
  0xe1   : > { %1512 = vmatmul.mubr.bf16.gmra.mrb[56].mxu0 %v3589_v62 }
  0xe2   : > { %1519 = vmatprep.mubr.bf16.mxu0 %v3593_v63 }
  0xe3   : > { %1673 = vmatmul.mubr.bf16.gmra.mrb[56].mxu1 %v3592_v0 }
  0xe4   : > { %1680 = vmatprep.mubr.bf16.mxu1 %v3596_v1 }
  0xe9   : > { %1520 = vmatmul.mubr.bf16.gmra.mrb[60].mxu0 %v3595_v2 }
  0xea   : > { %3313 = vmatprep.mubr.msk.bf16.mxu0 %vm1318_vm0, %v3599_v3 }
  0xeb   : > { %1681 = vmatmul.mubr.bf16.gmra.mrb[60].mxu1 %v3598_v4 }
  0xf1   : > { %3314 = vmatmul.mubr.msk.bf16.vlgmr.msra.gmra.mrb[64].mxu0 %vm1318_vm0, %v3600_v5 }
  0xf2   : > { %3317 = vmatprep.mubr.msk.bf16.mxu0 %vm1318_vm0, %v3601_v6 }
  0xf9   : > { %3318 = vmatmul.mubr.msk.bf16.gmra.mrb[68].mxu0 %vm1318_vm0, %v3602_v7 }
  0xfa   : > { %3321 = vmatprep.mubr.msk.bf16.mxu0 %vm1318_vm0, %v3603_v8 }
 0x101   : > { %3322 = vmatmul.mubr.msk.bf16.gmra.mrb[72].mxu0 %vm1318_vm0, %v3604_v9 }
 0x102   : > { %3325 = vmatprep.mubr.msk.bf16.mxu0 %vm1318_vm0, %v3605_v10 }
 0x109   : > { %3326 = vmatmul.mubr.msk.bf16.gmra.mrb[76].mxu0 %vm1318_vm0, %v3606_v11 }
 0x10a   : > { %3329 = vmatprep.mubr.msk.bf16.mxu0 %vm1318_vm0, %v3607_v12 }
 0x111   : > { %3330 = vmatmul.mubr.msk.bf16.gmra.mrb[80].mxu0 %vm1318_vm0, %v3608_v13 }
 0x112   : > { %3333 = vmatprep.mubr.msk.bf16.mxu0 %vm1318_vm0, %v3609_v14 }
 0x119   : > { %3334 = vmatmul.mubr.msk.bf16.gmra.mrb[84].mxu0 %vm1318_vm0, %v3610_v15 }
 0x11a   : > { %3337 = vmatprep.mubr.msk.bf16.mxu0 %vm1318_vm0, %v3611_v16 }
 0x121   : > { %3338 = vmatmul.mubr.msk.bf16.gmra.mrb[88].mxu0 %vm1318_vm0, %v3612_v17 }
 0x122   : > { %3341 = vmatprep.mubr.msk.bf16.mxu0 %vm1318_vm0, %v3613_v18 }
 0x129   : > { %3342 = vmatmul.mubr.msk.bf16.gmra.mrb[92].mxu0 %vm1318_vm0, %v3614_v19 }
 0x144   : > { %v3028_v20 = vpop.f32.mrb[0].mxu0 }
 0x145   : > { %v3029_v22 = vpop.f32.mrb[1].mxu0 }
 0x146   : > { %v3030_v23 = vadd.f32 %v3029_v22, %v3028_v20  ;;  %v3031_v24 = vpop.f32.mrb[2].mxu0  ;;  %v3140_v25 = vpop.f32.mrb[0].mxu1 }
 0x147   : > { %v3032_v26 = vpop.f32.mrb[3].mxu0  ;;  %v3141_v29 = vpop.f32.mrb[1].mxu1 }
 0x148   : > { %v1402_v27 = vadd.f32 %v3030_v23, %v4258_v21  ;;  %v3033_v28 = vadd.f32 %v3032_v26, %v3031_v24  ;;  %v3142_v30 = vadd.f32 %v3141_v29, %v3140_v25  ;;  %v3143_v31 = vpop.f32.mrb[2].mxu1 }
 0x149   : > { %v3144_v33 = vpop.f32.mrb[3].mxu1 }
 0x14a   : > { %v1405_v32 = vadd.f32 %v3033_v28, %v4258_v21  ;;  %v3145_v34 = vadd.f32 %v3144_v33, %v3143_v31  ;;  %v4262_v35 = vadd.f32 %v3142_v30, %v1402_v27 }
 0x14c   : > { %v3034_v36 = vpop.f32.mrb[4].mxu0  ;;  %v4264_v38 = vadd.f32 %v3145_v34, %v1405_v32 }
 0x14d   : > { %v3035_v37 = vpop.f32.mrb[5].mxu0 }
 0x14e   : > { %v3036_v39 = vadd.f32 %v3035_v37, %v3034_v36  ;;  %v3037_v40 = vpop.f32.mrb[6].mxu0  ;;  %v3146_v41 = vpop.f32.mrb[4].mxu1  ;;  %v3615_v36 = vld [vmem:[%s4692_s3 + $0x40] sm:$0xff]  }
 0x14f   : > { %v3038_v42 = vpop.f32.mrb[7].mxu0  ;;  %v3147_v45 = vpop.f32.mrb[5].mxu1  ;;  %v3616_v37 = vld [vmem:[%s4692_s3] sm:$0xff]   ;;  %3256 = vmatprep.subr.bf16.mxu1 %v3615_v36 }
 0x150   : > { %v1410_v43 = vadd.f32 %v3036_v39, %v4258_v21  ;;  %v3039_v44 = vadd.f32 %v3038_v42, %v3037_v40  ;;  %v3148_v46 = vadd.f32 %v3147_v45, %v3146_v41  ;;  %v3149_v47 = vpop.f32.mrb[6].mxu1  ;;  %3257 = vmatpush3.bf16.msra.mxu1 %v3616_v37 }
 0x151   : > { %v3150_v49 = vpop.f32.mrb[7].mxu1 }
 0x152   : > { %v1413_v48 = vadd.f32 %v3039_v44, %v4258_v21  ;;  %v3151_v50 = vadd.f32 %v3150_v49, %v3149_v47  ;;  %v4268_v51 = vadd.f32 %v3148_v46, %v1410_v43 }
 0x154   : > { %v3040_v52 = vpop.f32.mrb[8].mxu0  ;;  %v4270_v54 = vadd.f32 %v3151_v50, %v1413_v48 }
 0x155   : > { %v3041_v53 = vpop.f32.mrb[9].mxu0 }
 0x156   : > { %v3042_v55 = vadd.f32 %v3041_v53, %v3040_v52  ;;  %v3043_v56 = vpop.f32.mrb[10].mxu0  ;;  %v3152_v57 = vpop.f32.mrb[8].mxu1 }
 0x157   : > { %v3044_v58 = vpop.f32.mrb[11].mxu0  ;;  %v3153_v61 = vpop.f32.mrb[9].mxu1 }
 0x158   : > { %v1418_v59 = vadd.f32 %v3042_v55, %v4258_v21  ;;  %v3045_v60 = vadd.f32 %v3044_v58, %v3043_v56  ;;  %v3154_v62 = vadd.f32 %v3153_v61, %v3152_v57  ;;  %v3155_v63 = vpop.f32.mrb[10].mxu1 }
 0x159   : > { %v3156_v1 = vpop.f32.mrb[11].mxu1 }
 0x15a   : > { %v1421_v0 = vadd.f32 %v3045_v60, %v4258_v21  ;;  %v3157_v2 = vadd.f32 %v3156_v1, %v3155_v63  ;;  %v4274_v3 = vadd.f32 %v3154_v62, %v1418_v59 }
 0x15c   : > { %v3046_v4 = vpop.f32.mrb[12].mxu0  ;;  %v4276_v6 = vadd.f32 %v3157_v2, %v1421_v0 }
 0x15d   : > { %v3047_v5 = vpop.f32.mrb[13].mxu0 }
 0x15e   : > { %v3048_v7 = vadd.f32 %v3047_v5, %v3046_v4  ;;  %v3049_v8 = vpop.f32.mrb[14].mxu0  ;;  %v3158_v9 = vpop.f32.mrb[12].mxu1 }
 0x15f   : > { %v3050_v10 = vpop.f32.mrb[15].mxu0  ;;  %v3159_v13 = vpop.f32.mrb[13].mxu1 }
 0x160   : > { %v1426_v11 = vadd.f32 %v3048_v7, %v4258_v21  ;;  %v3051_v12 = vadd.f32 %v3050_v10, %v3049_v8  ;;  %v3160_v14 = vadd.f32 %v3159_v13, %v3158_v9  ;;  %v3161_v15 = vpop.f32.mrb[14].mxu1 }
 0x161   : > { %v3162_v17 = vpop.f32.mrb[15].mxu1 }
 0x162   : > { %v1429_v16 = vadd.f32 %v3051_v12, %v4258_v21  ;;  %v3163_v18 = vadd.f32 %v3162_v17, %v3161_v15  ;;  %v4280_v19 = vadd.f32 %v3160_v14, %v1426_v11  ;;  %v3617_v11 = vld [vmem:[%s4692_s3 + $0x48] sm:$0xff]  }
 0x163   : > { %v3618_v12 = vld [vmem:[%s4692_s3 + $0x8] sm:$0xff]   ;;  %3258 = vmatprep.subr.bf16.mxu1 %v3617_v11 }
 0x164   : > { %v3052_v20 = vpop.f32.mrb[16].mxu0  ;;  %v4282_v23 = vadd.f32 %v3163_v18, %v1429_v16  ;;  %3259 = vmatpush3.bf16.msra.mxu1 %v3618_v12 }
 0x165   : > { %v3053_v22 = vpop.f32.mrb[17].mxu0 }
 0x166   : > { %v3054_v24 = vadd.f32 %v3053_v22, %v3052_v20  ;;  %v3055_v25 = vpop.f32.mrb[18].mxu0  ;;  %v3164_v26 = vpop.f32.mrb[16].mxu1 }
 0x167   : > { %v3056_v27 = vpop.f32.mrb[19].mxu0  ;;  %v3165_v30 = vpop.f32.mrb[17].mxu1 }
 0x168   : > { %v1434_v28 = vadd.f32 %v3054_v24, %v4258_v21  ;;  %v3057_v29 = vadd.f32 %v3056_v27, %v3055_v25  ;;  %v3166_v31 = vadd.f32 %v3165_v30, %v3164_v26  ;;  %v3167_v32 = vpop.f32.mrb[18].mxu1 }
 0x169   : > { %v3168_v34 = vpop.f32.mrb[19].mxu1 }
 0x16a   : > { %v1437_v33 = vadd.f32 %v3057_v29, %v4258_v21  ;;  %v3169_v39 = vadd.f32 %v3168_v34, %v3167_v32  ;;  %v4292_v40 = vadd.f32 %v3166_v31, %v1434_v28  ;;  %v3619_v32 = vld [vmem:[%s4692_s3 + $0x50] sm:$0xff]  }
 0x16b   : > { %3260 = vmatprep.subr.bf16.mxu1 %v3619_v32 }
 0x16c   : > { %v3058_v41 = vpop.f32.mrb[20].mxu0  ;;  %v4294_v43 = vadd.f32 %v3169_v39, %v1437_v33  ;;  %v3620_v33 = vld [vmem:[%s4692_s3 + $0x10] sm:$0xff]  }
 0x16d   : > { %v3059_v42 = vpop.f32.mrb[21].mxu0  ;;  %3261 = vmatpush3.bf16.msra.mxu1 %v3620_v33 }
 0x16e   : > { %v3060_v44 = vadd.f32 %v3059_v42, %v3058_v41  ;;  %v3061_v45 = vpop.f32.mrb[22].mxu0  ;;  %v3170_v46 = vpop.f32.mrb[20].mxu1 }
 0x16f   : > { %v3062_v47 = vpop.f32.mrb[23].mxu0  ;;  %v3171_v50 = vpop.f32.mrb[21].mxu1 }
 0x170   : > { %v1442_v48 = vadd.f32 %v3060_v44, %v4258_v21  ;;  %v3063_v49 = vadd.f32 %v3062_v47, %v3061_v45  ;;  %v3172_v52 = vadd.f32 %v3171_v50, %v3170_v46  ;;  %v3173_v53 = vpop.f32.mrb[22].mxu1 }
 0x171   : > { %v3174_v56 = vpop.f32.mrb[23].mxu1 }
 0x172   : > { %v1445_v55 = vadd.f32 %v3063_v49, %v4258_v21  ;;  %v3175_v57 = vadd.f32 %v3174_v56, %v3173_v53  ;;  %v4298_v58 = vadd.f32 %v3172_v52, %v1442_v48 }
 0x174   : > { %v3064_v59 = vpop.f32.mrb[24].mxu0  ;;  %v4300_v61 = vadd.f32 %v3175_v57, %v1445_v55 }
 0x175   : > { %v3065_v60 = vpop.f32.mrb[25].mxu0 }
 0x176   : > { %v3066_v62 = vadd.f32 %v3065_v60, %v3064_v59  ;;  %v3067_v63 = vpop.f32.mrb[26].mxu0  ;;  %v3176_v0 = vpop.f32.mrb[24].mxu1  ;;  %v3621_v59 = vld [vmem:[%s4692_s3 + $0x58] sm:$0xff]  }
 0x177   : > { %v3068_v1 = vpop.f32.mrb[27].mxu0  ;;  %v3177_v5 = vpop.f32.mrb[25].mxu1  ;;  %v3622_v60 = vld [vmem:[%s4692_s3 + $0x18] sm:$0xff]   ;;  %3262 = vmatprep.subr.bf16.mxu1 %v3621_v59 }
 0x178   : > { %v1450_v2 = vadd.f32 %v3066_v62, %v4258_v21  ;;  %v3069_v4 = vadd.f32 %v3068_v1, %v3067_v63  ;;  %v3178_v7 = vadd.f32 %v3177_v5, %v3176_v0  ;;  %v3179_v8 = vpop.f32.mrb[26].mxu1  ;;  %v3623_v62 = vld [vmem:[%s4692_s3 + $0x60] sm:$0xff]   ;;  %3263 = vmatpush3.bf16.msra.mxu1 %v3622_v60 }
 0x179   : > { %v3180_v10 = vpop.f32.mrb[27].mxu1  ;;  %v3624_v5 = vld [vmem:[%s4692_s3 + $0x20] sm:$0xff]   ;;  %3264 = vmatprep.subr.bf16.mxu1 %v3623_v62 }
 0x17a   : > { %v1453_v9 = vadd.f32 %v3069_v4, %v4258_v21  ;;  %v3181_v13 = vadd.f32 %v3180_v10, %v3179_v8  ;;  %v4310_v14 = vadd.f32 %v3178_v7, %v1450_v2 }
 0x17c   : > { %v3070_v15 = vpop.f32.mrb[28].mxu0  ;;  %v4312_v17 = vadd.f32 %v3181_v13, %v1453_v9  ;;  %v3625_v9 = vld [vmem:[%s4692_s3 + $0x68] sm:$0xff]   ;;  %3265 = vmatpush3.bf16.msra.mxu1 %v3624_v5 }
 0x17d   : > { %v3071_v16 = vpop.f32.mrb[29].mxu0  ;;  %3266 = vmatprep.subr.bf16.mxu1 %v3625_v9 }
 0x17e   : > { %v3072_v18 = vadd.f32 %v3071_v16, %v3070_v15  ;;  %v3073_v20 = vpop.f32.mrb[30].mxu0  ;;  %v3182_v22 = vpop.f32.mrb[28].mxu1 }
 0x17f   : > { %v3074_v24 = vpop.f32.mrb[31].mxu0  ;;  %v3183_v27 = vpop.f32.mrb[29].mxu1 }
 0x180   : > { %v1458_v25 = vadd.f32 %v3072_v18, %v4258_v21  ;;  %v3075_v26 = vadd.f32 %v3074_v24, %v3073_v20  ;;  %v3184_v28 = vadd.f32 %v3183_v27, %v3182_v22  ;;  %v3185_v29 = vpop.f32.mrb[30].mxu1  ;;  %v3626_v20 = vld [vmem:[%s4692_s3 + $0x28] sm:$0xff]  }
 0x181   : > { %v3186_v31 = vpop.f32.mrb[31].mxu1  ;;  %3267 = vmatpush3.bf16.msra.mxu1 %v3626_v20 }
 0x182   : > { %v1461_v30 = vadd.f32 %v3075_v26, %v4258_v21  ;;  %v3187_v34 = vadd.f32 %v3186_v31, %v3185_v29  ;;  %v4322_v36 = vadd.f32 %v3184_v28, %v1458_v25 }
 0x184   : > { %v3076_v37 = vpop.f32.mrb[32].mxu0  ;;  %v4324_v41 = vadd.f32 %v3187_v34, %v1461_v30 }
 0x185   : > { %v3077_v39 = vpop.f32.mrb[33].mxu0 }
 0x186   : > { %v3078_v42 = vadd.f32 %v3077_v39, %v3076_v37  ;;  %v3079_v44 = vpop.f32.mrb[34].mxu0  ;;  %v3188_v45 = vpop.f32.mrb[32].mxu1 }
 0x187   : > { %v3080_v46 = vpop.f32.mrb[35].mxu0  ;;  %v3189_v49 = vpop.f32.mrb[33].mxu1 }
 0x188   : > { %v1466_v47 = vadd.f32 %v3078_v42, %v4258_v21  ;;  %v3081_v48 = vadd.f32 %v3080_v46, %v3079_v44  ;;  %v3190_v50 = vadd.f32 %v3189_v49, %v3188_v45  ;;  %v3191_v52 = vpop.f32.mrb[34].mxu1 }
 0x189   : > { %v3192_v55 = vpop.f32.mrb[35].mxu1 }
 0x18a   : > { %v1469_v53 = vadd.f32 %v3081_v48, %v4258_v21  ;;  %v3193_v56 = vadd.f32 %v3192_v55, %v3191_v52  ;;  %v4328_v57 = vadd.f32 %v3190_v50, %v1466_v47 }
 0x18c   : > { %v3082_v63 = vpop.f32.mrb[36].mxu0  ;;  %v4339_v1 = vadd.f32 %v3193_v56, %v1469_v53 }
 0x18d   : > { %v3083_v0 = vpop.f32.mrb[37].mxu0 }
 0x18e   : > { %v3084_v2 = vadd.f32 %v3083_v0, %v3082_v63  ;;  %v3085_v4 = vpop.f32.mrb[38].mxu0  ;;  %v3194_v7 = vpop.f32.mrb[36].mxu1 }
 0x18f   : > { %v3086_v8 = vpop.f32.mrb[39].mxu0  ;;  %v3195_v12 = vpop.f32.mrb[37].mxu1 }
 0x190   : > { %v1474_v10 = vadd.f32 %v3084_v2, %v4258_v21  ;;  %v3087_v11 = vadd.f32 %v3086_v8, %v3085_v4  ;;  %v3196_v13 = vadd.f32 %v3195_v12, %v3194_v7  ;;  %v3197_v15 = vpop.f32.mrb[38].mxu1 }
 0x191   : > { %v3198_v18 = vpop.f32.mrb[39].mxu1 }
 0x192   : > { %v1477_v16 = vadd.f32 %v3087_v11, %v4258_v21  ;;  %v3199_v22 = vadd.f32 %v3198_v18, %v3197_v15  ;;  %v4352_v24 = vadd.f32 %v3196_v13, %v1474_v10 }
 0x194   : > { %v3088_v25 = vpop.f32.mrb[40].mxu0  ;;  %v4354_v27 = vadd.f32 %v3199_v22, %v1477_v16 }
 0x195   : > { %v3089_v26 = vpop.f32.mrb[41].mxu0 }
 0x196   : > { %v3090_v28 = vadd.f32 %v3089_v26, %v3088_v25  ;;  %v3091_v29 = vpop.f32.mrb[42].mxu0  ;;  %v3200_v30 = vpop.f32.mrb[40].mxu1 }
 0x197   : > { %v3092_v31 = vpop.f32.mrb[43].mxu0  ;;  %v3201_v34 = vpop.f32.mrb[41].mxu1 }
 0x198   : > { %v1482_v32 = vadd.f32 %v3090_v28, %v4258_v21  ;;  %v3093_v33 = vadd.f32 %v3092_v31, %v3091_v29  ;;  %v3202_v37 = vadd.f32 %v3201_v34, %v3200_v30  ;;  %v3203_v39 = vpop.f32.mrb[42].mxu1 }
 0x199   : > { %v3204_v44 = vpop.f32.mrb[43].mxu1 }
 0x19a   : > { %v1485_v42 = vadd.f32 %v3093_v33, %v4258_v21  ;;  %v3205_v45 = vadd.f32 %v3204_v44, %v3203_v39  ;;  %v4358_v46 = vadd.f32 %v3202_v37, %v1482_v32 }
 0x19c   : > { %v3094_v47 = vpop.f32.mrb[44].mxu0  ;;  %v4360_v49 = vadd.f32 %v3205_v45, %v1485_v42 }
 0x19d   : > { %v3095_v48 = vpop.f32.mrb[45].mxu0 }
 0x19e   : > { %v3096_v50 = vadd.f32 %v3095_v48, %v3094_v47  ;;  %v3097_v52 = vpop.f32.mrb[46].mxu0  ;;  %v3206_v53 = vpop.f32.mrb[44].mxu1 }
 0x19f   : > { %v3098_v55 = vpop.f32.mrb[47].mxu0  ;;  %v3207_v60 = vpop.f32.mrb[45].mxu1 }
 0x1a0   : > { %v1490_v56 = vadd.f32 %v3096_v50, %v4258_v21  ;;  %v3099_v59 = vadd.f32 %v3098_v55, %v3097_v52  ;;  %v3208_v62 = vadd.f32 %v3207_v60, %v3206_v53  ;;  %v3209_v63 = vpop.f32.mrb[46].mxu1 }
 0x1a1   : > { %v3210_v2 = vpop.f32.mrb[47].mxu1 }
 0x1a2   : > { %v1493_v0 = vadd.f32 %v3099_v59, %v4258_v21  ;;  %v3211_v4 = vadd.f32 %v3210_v2, %v3209_v63  ;;  %v4364_v5 = vadd.f32 %v3208_v62, %v1490_v56 }
 0x1a4   : > { %v3100_v7 = vpop.f32.mrb[48].mxu0  ;;  %v4366_v9 = vadd.f32 %v3211_v4, %v1493_v0 }
 0x1a5   : > { %v3101_v8 = vpop.f32.mrb[49].mxu0 }
 0x1a6   : > { %v3102_v10 = vadd.f32 %v3101_v8, %v3100_v7  ;;  %v3103_v11 = vpop.f32.mrb[50].mxu0  ;;  %v3212_v12 = vpop.f32.mrb[48].mxu1 }
 0x1a7   : > { %v3104_v13 = vpop.f32.mrb[51].mxu0  ;;  %v3213_v18 = vpop.f32.mrb[49].mxu1 }
 0x1a8   : > { %v1498_v15 = vadd.f32 %v3102_v10, %v4258_v21  ;;  %v3105_v16 = vadd.f32 %v3104_v13, %v3103_v11  ;;  %v3214_v20 = vadd.f32 %v3213_v18, %v3212_v12  ;;  %v3215_v22 = vpop.f32.mrb[50].mxu1 }
 0x1a9   : > { %v3216_v26 = vpop.f32.mrb[51].mxu1 }
 0x1aa   : > { %v1501_v25 = vadd.f32 %v3105_v16, %v4258_v21  ;;  %v3217_v28 = vadd.f32 %v3216_v26, %v3215_v22  ;;  %v4370_v29 = vadd.f32 %v3214_v20, %v1498_v15 }
 0x1ac   : > { %v3106_v30 = vpop.f32.mrb[52].mxu0  ;;  %v4372_v32 = vadd.f32 %v3217_v28, %v1501_v25 }
 0x1ad   : > { %v3107_v31 = vpop.f32.mrb[53].mxu0 }
 0x1ae   : > { %v3108_v33 = vadd.f32 %v3107_v31, %v3106_v30  ;;  %v3109_v34 = vpop.f32.mrb[54].mxu0  ;;  %v3218_v37 = vpop.f32.mrb[52].mxu1 }
 0x1af   : > { %v3110_v39 = vpop.f32.mrb[55].mxu0  ;;  %v3219_v45 = vpop.f32.mrb[53].mxu1 }
 0x1b0   : > { %v1506_v42 = vadd.f32 %v3108_v33, %v4258_v21  ;;  %v3111_v44 = vadd.f32 %v3110_v39, %v3109_v34  ;;  %v3220_v47 = vadd.f32 %v3219_v45, %v3218_v37  ;;  %v3221_v48 = vpop.f32.mrb[54].mxu1 }
 0x1b1   : > { %v3222_v52 = vpop.f32.mrb[55].mxu1 }
 0x1b2   : > { %v1509_v50 = vadd.f32 %v3111_v44, %v4258_v21  ;;  %v3223_v53 = vadd.f32 %v3222_v52, %v3221_v48  ;;  %v4376_v55 = vadd.f32 %v3220_v47, %v1506_v42  ;;  %v3627_v48 = vld [vmem:[%s4692_s3 + $0x70] sm:$0xff]  }
 0x1b3   : > { %3268 = vmatprep.subr.bf16.mxu1 %v3627_v48 }
 0x1b4   : > { %v3112_v56 = vpop.f32.mrb[56].mxu0  ;;  %v4378_v60 = vadd.f32 %v3223_v53, %v1509_v50  ;;  %v3628_v50 = vld [vmem:[%s4692_s3 + $0x30] sm:$0xff]  }
 0x1b5   : > { %v3113_v59 = vpop.f32.mrb[57].mxu0  ;;  %3269 = vmatpush3.bf16.msra.mxu1 %v3628_v50 }
 0x1b6   : > { %v3114_v62 = vadd.f32 %v3113_v59, %v3112_v56  ;;  %v3115_v63 = vpop.f32.mrb[58].mxu0  ;;  %v3224_v0 = vpop.f32.mrb[56].mxu1 }
 0x1b7   : > { %v3116_v2 = vpop.f32.mrb[59].mxu0  ;;  %v3225_v8 = vpop.f32.mrb[57].mxu1 }
 0x1b8   : > { %v1514_v4 = vadd.f32 %v3114_v62, %v4258_v21  ;;  %v3117_v7 = vadd.f32 %v3116_v2, %v3115_v63  ;;  %v3226_v10 = vadd.f32 %v3225_v8, %v3224_v0  ;;  %v3227_v11 = vpop.f32.mrb[58].mxu1 }
 0x1b9   : > { %v3228_v13 = vpop.f32.mrb[59].mxu1 }
 0x1ba   : > { %v1517_v12 = vadd.f32 %v3117_v7, %v4258_v21  ;;  %v3229_v15 = vadd.f32 %v3228_v13, %v3227_v11  ;;  %v4382_v16 = vadd.f32 %v3226_v10, %v1514_v4 }
 0x1bc   : > { %v3118_v18 = vpop.f32.mrb[60].mxu0  ;;  %v4384_v22 = vadd.f32 %v3229_v15, %v1517_v12 }
 0x1bd   : > { %v3119_v20 = vpop.f32.mrb[61].mxu0 }
 0x1be   : > { %v3120_v25 = vadd.f32 %v3119_v20, %v3118_v18  ;;  %v3121_v26 = vpop.f32.mrb[62].mxu0  ;;  %v3230_v28 = vpop.f32.mrb[60].mxu1 }
 0x1bf   : > { %v3122_v30 = vpop.f32.mrb[63].mxu0  ;;  %v3231_v34 = vpop.f32.mrb[61].mxu1 }
 0x1c0   : > { %v1522_v31 = vadd.f32 %v3120_v25, %v4258_v21  ;;  %v3123_v33 = vadd.f32 %v3122_v30, %v3121_v26  ;;  %v3232_v37 = vadd.f32 %v3231_v34, %v3230_v28  ;;  %v3233_v39 = vpop.f32.mrb[62].mxu1  ;;  %v3629_v30 = vld [vmem:[%s4692_s3 + $0x78] sm:$0xff]  }
 0x1c1   : > { %v3234_v44 = vpop.f32.mrb[63].mxu1  ;;  %3270 = vmatprep.subr.bf16.mxu1 %v3629_v30 }
 0x1c2   : > { %v1525_v42 = vadd.f32 %v3123_v33, %v4258_v21  ;;  %v3235_v45 = vadd.f32 %v3234_v44, %v3233_v39  ;;  %v4388_v47 = vadd.f32 %v3232_v37, %v1522_v31 }
 0x1c4   : > { %v3315_v52 = vpop.f32.mrb[64].mxu0  ;;  %v4397_v59 = vadd.f32 %v3235_v45, %v1525_v42 }
 0x1c5   : > { %v1732_v53 = vadd.f32 %v3315_v52, %v4268_v51  ;;  %v1723_v56 = vpop.f32.mrb[65].mxu0 }
 0x1c6   : > { %v4400_v21 = vadd.f32 %v1723_v56, %v4262_v35  ;;  %v3316_v62 = vpop.f32.mrb[66].mxu0 }
 0x1c7   : > { %v1884_v63 = vmul.f32 0.01, %v1732_v53  ;;  %v1735_v0 = vadd.f32 %v3316_v62, %v4270_v54  ;;  %v1726_v2 = vpop.f32.mrb[67].mxu0  ;;  %vm1852_vm1 = vcmp.ge.f32.partialorder %v1732_v53, 0.0 }
 0x1c8   : > { %v4404_v4 = vadd.f32 %v1726_v2, %v4264_v38 }
 0x1c9   : > { %v1885_v7 = vmul.f32 0.01, %v1735_v0  ;;  %vm1853_vm2 = vcmp.ge.f32.partialorder %v1735_v0, 0.0  ;;  %v1916_v51 = vsel %vm1852_vm1, %v1732_v53, %v1884_v63 }
 0x1cb   : > { %v1917_v8 = vsel %vm1853_vm2, %v1735_v0, %v1885_v7 }
 0x1cc   : > { %v3319_v10 = vpop.f32.mrb[68].mxu0  ;;  %v3407_v11 = vpack.i.bf16 %v1917_v8, %v1916_v51 }
 0x1cd   : > { %v1748_v12 = vadd.f32 %v3319_v10, %v4280_v19  ;;  %v1739_v35 = vpop.f32.mrb[69].mxu0 }
 0x1ce   : > { %v1740_v13 = vadd.f32 %v1739_v35, %v4274_v3  ;;  %v3320_v15 = vpop.f32.mrb[70].mxu0  ;;  %3408 = vrot.lane.b32.xlu0 %v3407_v11, %s3739_s23 }
 0x1cf   : > { %v1888_v54 = vmul.f32 0.01, %v1748_v12  ;;  %v1751_v38 = vadd.f32 %v3320_v15, %v4282_v23  ;;  %v1742_v18 = vpop.f32.mrb[71].mxu0  ;;  %vm1856_vm3 = vcmp.ge.f32.partialorder %v1748_v12, 0.0  ;;  %v3630_v23 = vld [vmem:[%s4692_s3 + $0x38] sm:$0xff]  }
 0x1d0   : > { %v1886_v20 = vmul.f32 0.01, %v1740_v13  ;;  %v1743_v25 = vadd.f32 %v1742_v18, %v4276_v6  ;;  %vm1854_vm5 = vcmp.ge.f32.partialorder %v1740_v13, 0.0  ;;  %3271 = vmatpush3.bf16.msra.mxu1 %v3630_v23 }
 0x1d1   : > { %vm1857_vm4 = vcmp.ge.f32.partialorder %v1751_v38, 0.0  ;;  %v1889_v26 = vmul.f32 0.01, %v1751_v38  ;;  %v4411_v19 = vsel %vm1856_vm3, %v1748_v12, %v1888_v54 }
 0x1d2   : > { %v1887_v28 = vmul.f32 0.01, %v1743_v25  ;;  %vm1855_vm6 = vcmp.ge.f32.partialorder %v1743_v25, 0.0  ;;  %v1918_v33 = vsel %vm1854_vm5, %v1740_v13, %v1886_v20 }
 0x1d3   : > { %v4413_v3 = vsel %vm1857_vm4, %v1751_v38, %v1889_v26 }
 0x1d4   : > { %v3323_v31 = vpop.f32.mrb[72].mxu0  ;;  %v1919_v6 = vsel %vm1855_vm6, %v1743_v25, %v1887_v28  ;;  %v3432_v34 = vpack.i.bf16 %v4413_v3, %v4411_v19 }
 0x1d5   : > { %v1764_v37 = vadd.f32 %v3323_v31, %v4298_v58  ;;  %v1755_v39 = vpop.f32.mrb[73].mxu0  ;;  %v3412_v42 = vpack.i.bf16 %v1919_v6, %v1918_v33 }
 0x1d6   : > { %v4425_v44 = vadd.f32 %v1755_v39, %v4292_v40  ;;  %v3324_v45 = vpop.f32.mrb[74].mxu0 }
 0x1d7   : > { %v1892_v48 = vmul.f32 0.01, %v1764_v37  ;;  %v1767_v50 = vadd.f32 %v3324_v45, %v4300_v61  ;;  %v1758_v52 = vpop.f32.mrb[75].mxu0  ;;  %3413 = vrot.lane.b32.xlu1 %v3412_v42, %s3740_s22  ;;  %vm1860_vm7 = vcmp.ge.f32.partialorder %v1764_v37, 0.0 }
 0x1d8   : > { %v4430_v53 = vadd.f32 %v1758_v52, %v4294_v43 }
 0x1d9   : > { %vm1861_vm8 = vcmp.ge.f32.partialorder %v1767_v50, 0.0  ;;  %v1893_v58 = vmul.f32 0.01, %v1767_v50  ;;  %v1924_v56 = vsel %vm1860_vm7, %v1764_v37, %v1892_v48 }
 0x1db   : > { %v1925_v62 = vsel %vm1861_vm8, %v1767_v50, %v1893_v58 }
 0x1dc   : > { %v3327_v63 = vpop.f32.mrb[76].mxu0  ;;  %v3417_v40 = vpack.i.bf16 %v1925_v62, %v1924_v56 }
 0x1dd   : > { %v1780_v0 = vadd.f32 %v3327_v63, %v4322_v36  ;;  %v1771_v2 = vpop.f32.mrb[77].mxu0 }
 0x1de   : > { %v1772_v7 = vadd.f32 %v1771_v2, %v4310_v14  ;;  %v3328_v61 = vpop.f32.mrb[78].mxu0  ;;  %3418 = vrot.lane.b32.xlu0 %v3417_v40, %s3739_s23  ;;  %v3631_v14 = vld [vmem:[%s4692_s3 + $0xc0] sm:$0xff]  }
 0x1df   : > { %v1896_v51 = vmul.f32 0.01, %v1780_v0  ;;  %v1783_v8 = vadd.f32 %v3328_v61, %v4324_v41  ;;  %v1774_v10 = vpop.f32.mrb[79].mxu0  ;;  %vm1864_vm9 = vcmp.ge.f32.partialorder %v1780_v0, 0.0  ;;  %3278 = vmatprep.subr.bf16.mxu1 %v3631_v14 }
 0x1e0   : > { %v1894_v43 = vmul.f32 0.01, %v1772_v7  ;;  %v1775_v11 = vadd.f32 %v1774_v10, %v4312_v17  ;;  %vm1862_vm10 = vcmp.ge.f32.partialorder %v1772_v7, 0.0 }
 0x1e1   : > { %vm1865_vm11 = vcmp.ge.f32.partialorder %v1783_v8, 0.0  ;;  %v1897_v12 = vmul.f32 0.01, %v1783_v8  ;;  %v1928_v36 = vsel %vm1864_vm9, %v1780_v0, %v1896_v51 }
 0x1e2   : > { %vm1863_vm12 = vcmp.ge.f32.partialorder %v1775_v11, 0.0  ;;  %v1895_v35 = vmul.f32 0.01, %v1775_v11  ;;  %v1926_v38 = vsel %vm1862_vm10, %v1772_v7, %v1894_v43  ;;  %vm1858_vm10 = vcmp.ge.f32.partialorder %v4425_v44, 0.0 }
 0x1e3   : > { %v1929_v13 = vsel %vm1865_vm11, %v1783_v8, %v1897_v12  ;;  %vm1859_vm11 = vcmp.ge.f32.partialorder %v4430_v53, 0.0 }
 0x1e4   : > { %v3331_v15 = vpop.f32.mrb[80].mxu0  ;;  %v3422_v54 = vpack.i.bf16 %v1929_v13, %v1928_v36  ;;  %v1927_v41 = vsel %vm1863_vm12, %v1775_v11, %v1895_v35  ;;  %vm1850_vm12 = vcmp.ge.f32.partialorder %v4400_v21, 0.0 }
 0x1e5   : > { %v1796_v18 = vadd.f32 %v3331_v15, %v4352_v24  ;;  %v1787_v20 = vpop.f32.mrb[81].mxu0  ;;  %v3427_v25 = vpack.i.bf16 %v1927_v41, %v1926_v38 }
 0x1e6   : > { %v4442_v17 = vadd.f32 %v1787_v20, %v4328_v57  ;;  %v3332_v26 = vpop.f32.mrb[82].mxu0  ;;  %3423 = vrot.lane.b32.xlu0 %v3422_v54, %s3741_s25 }
 0x1e7   : > { %v1900_v28 = vmul.f32 0.01, %v1796_v18  ;;  %v1799_v19 = vadd.f32 %v3332_v26, %v4354_v27  ;;  %v1790_v3 = vpop.f32.mrb[83].mxu0  ;;  %3428 = vrot.lane.b32.xlu1 %v3427_v25, %s3740_s22  ;;  %vm1868_vm13 = vcmp.ge.f32.partialorder %v1796_v18, 0.0 }
 0x1e8   : > { %v4448_v30 = vadd.f32 %v1790_v3, %v4339_v1 }
 0x1e9   : > { %vm1869_vm14 = vcmp.ge.f32.partialorder %v1799_v19, 0.0  ;;  %v1901_v24 = vmul.f32 0.01, %v1799_v19  ;;  %v1932_v57 = vsel %vm1868_vm13, %v1796_v18, %v1900_v28  ;;  %v1890_v28 = vmul.f32 0.01, %v4425_v44 }
 0x1ea   : > { %vm2042_vm13 = vcmask 261120  }
 0x1eb   : > { %3433 = vrot.lane.b32.xlu1 %v3432_v34, %s3741_s25  ;;  %v1933_v23 = vsel %vm1869_vm14, %v1799_v19, %v1901_v24  ;;  %vm1851_vm14 = vcmp.ge.f32.partialorder %v4404_v4, 0.0 }
 0x1ec   : > { %v3335_v31 = vpop.f32.mrb[84].mxu0  ;;  %v3437_v33 = vpack.i.bf16 %v1933_v23, %v1932_v57  ;;  %v1882_v23 = vmul.f32 0.01, %v4400_v21 }
 0x1ed   : > { %v1812_v6 = vadd.f32 %v3335_v31, %v4364_v5  ;;  %v1803_v37 = vpop.f32.mrb[85].mxu0  ;;  %v1883_v31 = vmul.f32 0.01, %v4404_v4 }
 0x1ee   : > { %v1804_v27 = vadd.f32 %v1803_v37, %v4358_v46  ;;  %v3336_v39 = vpop.f32.mrb[86].mxu0 }
 0x1ef   : > { %v1904_v42 = vmul.f32 0.01, %v1812_v6  ;;  %v1815_v45 = vadd.f32 %v3336_v39, %v4366_v9  ;;  %v1806_v48 = vpop.f32.mrb[87].mxu0  ;;  %3438 = vrot.lane.b32.xlu1 %v3437_v33, %s3739_s23  ;;  %vm1872_vm15 = vcmp.ge.f32.partialorder %v1812_v6, 0.0  ;;  %v1922_v33 = vsel %vm1858_vm10, %v4425_v44, %v1890_v28 }
 0x1f0   : > { %v1902_v1 = vmul.f32 0.01, %v1804_v27  ;;  %v1807_v34 = vadd.f32 %v1806_v48, %v4360_v49  ;;  %vm1870_vm1 = vcmp.ge.f32.partialorder %v1804_v27, 0.0  ;;  %v1914_v44 = vsel %vm1850_vm12, %v4400_v21, %v1882_v23  ;;  %v3641_v23 = vld [vmem:[%s4692_s3 + $0xe8] sm:$0xff]  }
 0x1f1   : > { %vm1873_vm2 = vcmp.ge.f32.partialorder %v1815_v45, 0.0  ;;  %v1905_v50 = vmul.f32 0.01, %v1815_v45  ;;  %v1936_v5 = vsel %vm1872_vm15, %v1812_v6, %v1904_v42  ;;  %vm2047_vm15 = vcmask 785408  }
 0x1f2   : > { %vm1871_vm3 = vcmp.ge.f32.partialorder %v1807_v34, 0.0  ;;  %v1903_v52 = vmul.f32 0.01, %v1807_v34  ;;  %v1934_v46 = vsel %vm1870_vm1, %v1804_v27, %v1902_v1  ;;  %vm1866_vm1 = vcmp.ge.f32.partialorder %v4442_v17, 0.0 }
 0x1f3   : > { %v1937_v58 = vsel %vm1873_vm2, %v1815_v45, %v1905_v50  ;;  %vm1867_vm2 = vcmp.ge.f32.partialorder %v4448_v30, 0.0 }
 0x1f4   : > { %v3339_v56 = vpop.f32.mrb[88].mxu0  ;;  %v1935_v62 = vsel %vm1871_vm3, %v1807_v34, %v1903_v52  ;;  %v3462_v63 = vpack.i.bf16 %v1937_v58, %v1936_v5 }
 0x1f5   : > { %v1828_v9 = vadd.f32 %v3339_v56, %v4376_v55  ;;  %v1819_v40 = vpop.f32.mrb[89].mxu0  ;;  %v3442_v0 = vpack.i.bf16 %v1935_v62, %v1934_v46  ;;  %v1915_v46 = vsel %vm1851_vm14, %v4404_v4, %v1883_v31  ;;  %v3642_v31 = vld [vmem:[%s4692_s3 + $0xa8] sm:$0xff]  }
 0x1f6   : > { %v4458_v2 = vadd.f32 %v1819_v40, %v4370_v29  ;;  %v3340_v7 = vpop.f32.mrb[90].mxu0 }
 0x1f7   : > { %v1908_v49 = vmul.f32 0.01, %v1828_v9  ;;  %v1831_v61 = vadd.f32 %v3340_v7, %v4378_v60  ;;  %v1822_v51 = vpop.f32.mrb[91].mxu0  ;;  %3443 = vrot.lane.b32.xlu1 %v3442_v0, %s3740_s22  ;;  %vm1876_vm4 = vcmp.ge.f32.partialorder %v1828_v9, 0.0 }
 0x1f8   : > { %v4463_v8 = vadd.f32 %v1822_v51, %v4372_v32  ;;  %vm1874_vm3 = vcmp.ge.f32.partialorder %v4458_v2, 0.0 }
 0x1f9   : > { %vm1877_vm5 = vcmp.ge.f32.partialorder %v1831_v61, 0.0  ;;  %v1909_v10 = vmul.f32 0.01, %v1831_v61  ;;  %v1940_v55 = vsel %vm1876_vm4, %v1828_v9, %v1908_v49 }
 0x1fa   : > { %vm1875_vm4 = vcmp.ge.f32.partialorder %v4463_v8, 0.0 }
 0x1fb   : > { %3463 = vrot.lane.b32.xlu1 %v3462_v63, %s3741_s25  ;;  %v1941_v43 = vsel %vm1877_vm5, %v1831_v61, %v1909_v10  ;;  %vm3743_vm5 = vmmov 0  }
 0x1fc   : > { %v3343_v11 = vpop.f32.mrb[92].mxu0  ;;  %v3447_v29 = vpack.i.bf16 %v1941_v43, %v1940_v55  ;;  %v3632_v55 = vld [vmem:[%s4692_s3 + $0x80] sm:$0xff]  }
 0x1fd   : > { %v1844_v12 = vadd.f32 %v3343_v11, %v4388_v47  ;;  %v1835_v35 = vpop.f32.mrb[93].mxu0  ;;  %v3633_v11 = vld [vmem:[%s4692_s3 + $0xc8] sm:$0xff]  }
 0x1fe   : > { %v1836_v60 = vadd.f32 %v1835_v35, %v4382_v16  ;;  %v3344_v36 = vpop.f32.mrb[94].mxu0  ;;  %3448 = vrot.lane.b32.xlu0 %v3447_v29, %s3739_s23  ;;  %v3634_v29 = vld [vmem:[%s4692_s3 + $0x88] sm:$0xff]   ;;  %v3635_v35 = vld [vmem:[%s4692_s3 + $0xd0] sm:$0xff]   ;;  %s523_s23 = scalar_lea.vmem [#allocation3], %s2815_s17 }
 0x1ff   : > { %v1912_v13 = vmul.f32 0.01, %v1844_v12  ;;  %v1847_v32 = vadd.f32 %v3344_v36, %v4397_v59  ;;  %v1838_v14 = vpop.f32.mrb[95].mxu0  ;;  %vm1880_vm6 = vcmp.ge.f32.partialorder %v1844_v12, 0.0  ;;  %v1898_v36 = vmul.f32 0.01, %v4442_v17 }
 0x200   : > { %v1910_v15 = vmul.f32 0.01, %v1836_v60  ;;  %v1839_v54 = vadd.f32 %v1838_v14, %v4384_v22  ;;  %vm1878_vm7 = vcmp.ge.f32.partialorder %v1836_v60, 0.0  ;;  %v1891_v22 = vmul.f32 0.01, %v4430_v53  ;;  %v3637_v14 = vld [vmem:[%s4692_s3 + $0xd8] sm:$0xff]  }
 0x201   : > { %vm1881_vm8 = vcmp.ge.f32.partialorder %v1847_v32, 0.0  ;;  %v1913_v38 = vmul.f32 0.01, %v1847_v32  ;;  %v1944_v47 = vsel %vm1880_vm6, %v1844_v12, %v1912_v13  ;;  %v1899_v13 = vmul.f32 0.01, %v4448_v30  ;;  %s2672_s18 = sshll.u32 %s523_s23, 4  ;;  %s4640_s18 = int_to_ptr.vmem [resolvable:$true] %s2672_s18 }
 0x202   : > { %vm1879_vm9 = vcmp.ge.f32.partialorder %v1839_v54, 0.0  ;;  %v1911_v41 = vmul.f32 0.01, %v1839_v54  ;;  %v1942_v20 = vsel %vm1878_vm7, %v1836_v60, %v1910_v15  ;;  %v1923_v37 = vsel %vm1859_vm11, %v4430_v53, %v1891_v22  ;;  %v3636_v60 = vld [vmem:[%s4692_s3 + $0x90] sm:$0xff]   ;;  %s3675_s9 = scalar_lea.vmem %s4640_s18, 512 }
 0x203   : > { %v1945_v18 = vsel %vm1881_vm8, %v1847_v32, %v1913_v38  ;;  %p3676_p13 = scmp.ne.s32.totalorder %s4640_s18, %s3675_s9 }
 0x204   : > { %v1943_v16 = vsel %vm1879_vm9, %v1839_v54, %v1911_v41  ;;  %v3457_v25 = vpack.i.bf16 %v1945_v18, %v1944_v47  ;;  %v3638_v47 = vld [vmem:[%s4692_s3 + $0x98] sm:$0xff]   ;;  %v1930_v18 = vsel %vm1866_vm1, %v4442_v17, %v1898_v36 }
 0x205   : > { %v3452_v26 = vpack.i.bf16 %v1943_v16, %v1942_v20  ;;  %v1931_v20 = vsel %vm1867_vm2, %v4448_v30, %v1899_v13  ;;  %v3668_v36 = vld [vmem:[%s4696_s7 + $0x54] ss:$8 sps:$4 sm:$0xff]   ;;  %v3666_v13 = vld [vmem:[%s4696_s7 + $0x50] ss:$8 sps:$4 sm:$0xff]   ;;  %p3677_p0 = pnand %p3676_p13, %p3831_p6 }
 0x207   : > { %3453 = vrot.lane.b32.xlu0 %v3452_v26, %s3740_s22  ;;  %s4645_s22 = scalar_lea.hbm %s4697_s8, %s3011_s19  ;;  %p3678_p1 = pneg %p3677_p0 }
 0x20b   : > { %3458 = vrot.lane.b32.xlu0 %v3457_v25, %s3741_s25  ;;  %v3639_v25 = vld [vmem:[%s4692_s3 + $0xe0] sm:$0xff]   ;;  %s3679_s25 = sshll.u32 %s3745_s26, 4  ;;  %s3680_s25 = int_to_ptr.vmem [resolvable:$false] %s3679_s25 }
 0x20c   : > { %s3681_s10 = scalar_lea.vmem %s3680_s25, 1024  ;;  %p3682_p2 = scmp.lt.s32.totalorder %s4640_s18, %s3680_s25 }
 0x20d   : > { %p3683_p3 = scmp.lt.s32.totalorder %s3681_s10, %s3675_s9 }
 0x20f   : > { %p3684_p4 = por %p3683_p3, %p3682_p2 }
 0x211   : > { %p3685_p5 = pnand %p3684_p4, %p3678_p1 }
 0x240   : > { %v3409_v59 = vpop.permute.xlu0 %3408 }
 0x241   : > { %v3411_v27 = vunpack.i.h.bf16 %v3409_v59  ;;  %v3410_v39 = vunpack.i.l.bf16 %v3409_v59 }
 0x243   : > { %v2043_v62 = vsel %vm2042_vm13, %v1914_v44, %v3410_v39  ;;  %v2044_v0 = vsel %vm2042_vm13, %v1915_v46, %v3411_v27  ;;  %v1906_v27 = vmul.f32 0.01, %v4458_v2  ;;  %v1907_v39 = vmul.f32 0.01, %v4463_v8 }
 0x249   : > { %v3414_v3 = vpop.permute.xlu1 %3413 }
 0x24a   : > { %v3416_v45 = vunpack.i.h.bf16 %v3414_v3  ;;  %v3415_v48 = vunpack.i.l.bf16 %v3414_v3 }
 0x24c   : > { %v2045_v61 = vsel %vm1318_vm0, %v2043_v62, %v3415_v48  ;;  %v2046_v51 = vsel %vm1318_vm0, %v2044_v0, %v3416_v45  ;;  %v3645_v45 = vld [vmem:[%s4692_s3 + $0xf8] sm:$0xff]  }
 0x250   : > { %v3419_v19 = vpop.permute.xlu0 %3418 }
 0x251   : > { %v3421_v24 = vunpack.i.h.bf16 %v3419_v19  ;;  %v3420_v57 = vunpack.i.l.bf16 %v3419_v19 }
 0x253   : > { %v2051_v50 = vsel %vm2042_vm13, %v1923_v37, %v3421_v24  ;;  %v2050_v52 = vsel %vm2042_vm13, %v1922_v33, %v3420_v57  ;;  %v3640_v24 = vld [vmem:[%s4692_s3 + $0xa0] sm:$0xff]   ;;  %v3644_v37 = vld [vmem:[%s4692_s3 + $0xb0] sm:$0xff]  }
 0x258   : > { %v3424_v6 = vpop.permute.xlu0 %3423 }
 0x259   : > { %v3429_v42 = vpop.permute.xlu1 %3428  ;;  %v3426_v5 = vunpack.i.h.bf16 %v3424_v6  ;;  %v3425_v58 = vunpack.i.l.bf16 %v3424_v6  ;;  %v3643_v6 = vld [vmem:[%s4692_s3 + $0xf0] sm:$0xff]  }
 0x25a   : > { %v3431_v1 = vunpack.i.h.bf16 %v3429_v42  ;;  %v3430_v34 = vunpack.i.l.bf16 %v3429_v42 }
 0x25c   : > { %v2052_v53 = vsel %vm1318_vm0, %v2050_v52, %v3430_v34  ;;  %v2053_v56 = vsel %vm1318_vm0, %v2051_v50, %v3431_v1  ;;  %v3646_v52 = vld [vmem:[%s4692_s3 + $0xb8] sm:$0xff]  }
 0x25d   : > { %v3434_v63 = vpop.permute.xlu1 %3433  ;;  %v2054_v9 = vsel %vm2047_vm15, %v2052_v53, %v3425_v58  ;;  %v2055_v40 = vsel %vm2047_vm15, %v2053_v56, %v3426_v5  ;;  %v1938_v5 = vsel %vm1874_vm3, %v4458_v2, %v1906_v27  ;;  %v1939_v58 = vsel %vm1875_vm4, %v4463_v8, %v1907_v39  ;;  %v3647_v8 = vld [vmem:[%s4694_s5] sm:$0xff]  }
 0x25e   : > { %v3436_v7 = vunpack.i.h.bf16 %v3434_v63  ;;  %v3435_v49 = vunpack.i.l.bf16 %v3434_v63  ;;  %v2069_v21 = vpack.c.bf16 %v2055_v40, %v2054_v9  ;;  %v3744_v27 = vmov 0   ;;  %v2982_v39 = vld [vmem:[%s4695_s6] ss:$0 sm:$0xff] }
 0x25f   : > { %2642 = vmatprep.mubr.bf16.mxu0 %v3744_v27 }
 0x260   : > { %v2048_v10 = vsel %vm2047_vm15, %v2045_v61, %v3435_v49  ;;  %v2049_v4 = vsel %vm2047_vm15, %v2046_v51, %v3436_v7  ;;  %2367 = vmatprep.mubr.bf16.mxu1 %v2069_v21  ;;  %v3742_v7 = vmov 0.0   ;;  %v3648_v49 = vld [vmem:[%s4694_s5 + $0x8] sm:$0xff]   ;;  %v3649_v21 = vld [vmem:[%s4694_s5 + $0x10] sm:$0xff]   ;;  %v3650_v61 = vld [vmem:[%s4694_s5 + $0x18] sm:$0xff]  }
 0x261   : > { %v2068_v43 = vpack.c.bf16 %v2049_v4, %v2048_v10  ;;  %v3439_v12 = vpop.permute.xlu1 %3438  ;;  %v3651_v51 = vld [vmem:[%s4696_s7] ss:$8 sps:$4 sm:$0xff]   ;;  %v3653_v10 = vld [vmem:[%s4696_s7 + $0x4] ss:$8 sps:$4 sm:$0xff]   ;;  %v3656_v4 = vld [vmem:[%s4696_s7 + $0x14] ss:$8 sps:$4 sm:$0xff]  }
 0x262   : > { %v3441_v15 = vunpack.i.h.bf16 %v3439_v12  ;;  %v3440_v54 = vunpack.i.l.bf16 %v3439_v12  ;;  %2610 = vmatprep.subr.bf16.mxu0 %v3653_v10  ;;  %v3660_v12 = vld [vmem:[%s4696_s7 + $0x30] ss:$8 sps:$4 sm:$0xff]  }
 0x263   : > { %2368 = vmatmul.mubr.bf16.vlgmr.msra.gmra.mrb[64].mxu1 %v2068_v43  ;;  %2611 = vmatpush1.bf16.msra.mxu0 %v3651_v51  ;;  %v3659_v43 = vld [vmem:[%s4696_s7 + $0x24] ss:$8 sps:$4 sm:$0xff]  }
 0x264   : > { %3279 = vmatpush3.bf16.msra.mxu1 %v3632_v55  ;;  %v2057_v26 = vsel %vm2042_vm13, %v1931_v20, %v3441_v15  ;;  %v2056_v59 = vsel %vm2042_vm13, %v1930_v18, %v3440_v54  ;;  %v3654_v55 = vld [vmem:[%s4696_s7 + $0x10] ss:$8 sps:$4 sm:$0xff]   ;;  %2612 = vmatprep.subr.bf16.mxu0 %v3656_v4  ;;  %v2949_v20 = vld [vmem:[%s4693_s4] ss:$0 sm:$0xff] }
 0x265   : > { %3280 = vmatprep.subr.bf16.mxu1 %v3633_v11  ;;  %v3657_v11 = vld [vmem:[%s4696_s7 + $0x20] ss:$8 sps:$4 sm:$0xff]  }
 0x267   : > { %2613 = vmatpush1.bf16.msra.mxu0 %v3654_v55 }
 0x268   : > { %3281 = vmatpush3.bf16.msra.mxu1 %v3634_v29  ;;  %2614 = vmatprep.subr.bf16.mxu0 %v3659_v43  ;;  %v3662_v29 = vld [vmem:[%s4696_s7 + $0x34] ss:$8 sps:$4 sm:$0xff]  }
 0x269   : > { %v3444_v32 = vpop.permute.xlu1 %3443  ;;  %3282 = vmatprep.subr.bf16.mxu1 %v3635_v35  ;;  %v3665_v35 = vld [vmem:[%s4696_s7 + $0x44] ss:$8 sps:$4 sm:$0xff]  }
 0x26a   : > { %v3446_v38 = vunpack.i.h.bf16 %v3444_v32  ;;  %v3445_v41 = vunpack.i.l.bf16 %v3444_v32  ;;  %v3671_v32 = vld [vmem:[%s4696_s7 + $0x64] ss:$8 sps:$4 sm:$0xff]  }
 0x26b   : > { %2615 = vmatpush1.bf16.msra.mxu0 %v3657_v11 }
 0x26c   : > { %3283 = vmatpush3.bf16.msra.mxu1 %v3636_v60  ;;  %v2058_v22 = vsel %vm1318_vm0, %v2056_v59, %v3445_v41  ;;  %v2059_v3 = vsel %vm1318_vm0, %v2057_v26, %v3446_v38  ;;  %2616 = vmatprep.subr.bf16.mxu0 %v3662_v29  ;;  %v3663_v60 = vld [vmem:[%s4696_s7 + $0x40] ss:$8 sps:$4 sm:$0xff]  }
 0x26d   : > { %v3464_v16 = vpop.permute.xlu1 %3463  ;;  %3284 = vmatprep.subr.bf16.mxu1 %v3637_v14  ;;  %v3669_v14 = vld [vmem:[%s4696_s7 + $0x60] ss:$8 sps:$4 sm:$0xff]  }
 0x26e   : > { %v3466_v28 = vunpack.i.h.bf16 %v3464_v16  ;;  %v3465_v19 = vunpack.i.l.bf16 %v3464_v16 }
 0x26f   : > { %2617 = vmatpush1.bf16.msra.mxu0 %v3660_v12 }
 0x270   : > { %v2060_v17 = vsel %vm2047_vm15, %v2058_v22, %v3465_v19  ;;  %v2061_v30 = vsel %vm2047_vm15, %v2059_v3, %v3466_v28  ;;  %3285 = vmatpush3.bf16.msra.mxu1 %v3638_v47  ;;  %v3449_v33 = vpop.permute.xlu0 %3448  ;;  %2618 = vmatprep.subr.bf16.mxu0 %v3665_v35 }
 0x271   : > { %v2070_v57 = vpack.c.bf16 %v2061_v30, %v2060_v17  ;;  %3286 = vmatprep.subr.bf16.mxu1 %v3639_v25  ;;  %v3451_v48 = vunpack.i.h.bf16 %v3449_v33  ;;  %v3450_v1 = vunpack.i.l.bf16 %v3449_v33 }
 0x273   : > { %v2063_v53 = vsel %vm2042_vm13, %v1939_v58, %v3451_v48  ;;  %v2062_v56 = vsel %vm2042_vm13, %v1938_v5, %v3450_v1  ;;  %2619 = vmatpush1.bf16.msra.mxu0 %v3663_v60 }
 0x274   : > { %3287 = vmatpush3.bf16.msra.mxu1 %v3640_v24  ;;  %2620 = vmatprep.subr.bf16.mxu0 %v3668_v36 }
 0x275   : > { %3288 = vmatprep.subr.bf16.mxu1 %v3641_v23 }
 0x277   : > { %2621 = vmatpush1.bf16.msra.mxu0 %v3666_v13 }
 0x278   : > { %3289 = vmatpush3.bf16.msra.mxu1 %v3642_v31  ;;  %2622 = vmatprep.subr.bf16.mxu0 %v3671_v32 }
 0x279   : > { %v3454_v42 = vpop.permute.xlu0 %3453  ;;  %3290 = vmatprep.subr.bf16.mxu1 %v3643_v6  ;;  %v3674_v6 = vld [vmem:[%s4696_s7 + $0x74] ss:$8 sps:$4 sm:$0xff]  }
 0x27a   : > { %v3456_v34 = vunpack.i.h.bf16 %v3454_v42  ;;  %v3455_v50 = vunpack.i.l.bf16 %v3454_v42 }
 0x27b   : > { %2623 = vmatpush1.bf16.msra.mxu0 %v3669_v14 }
 0x27c   : > { %3291 = vmatpush3.bf16.msra.mxu1 %v3644_v37  ;;  %v2064_v63 = vsel %vm1318_vm0, %v2062_v56, %v3455_v50  ;;  %v2065_v9 = vsel %vm1318_vm0, %v2063_v53, %v3456_v34  ;;  %v3672_v37 = vld [vmem:[%s4696_s7 + $0x70] ss:$8 sps:$4 sm:$0xff]   ;;  %2624 = vmatprep.subr.bf16.mxu0 %v3674_v6 }
 0x27d   : > { %v3459_v44 = vpop.permute.xlu0 %3458  ;;  %3292 = vmatprep.subr.bf16.mxu1 %v3645_v45 }
 0x27e   : > { %v3461_v46 = vunpack.i.h.bf16 %v3459_v44  ;;  %v3460_v62 = vunpack.i.l.bf16 %v3459_v44 }
 0x27f   : > { %2625 = vmatpush1.bf16.msra.mxu0 %v3672_v37 }
 0x280   : > { %3293 = vmatpush3.bf16.msra.mxu1 %v3646_v52  ;;  %v2066_v40 = vsel %vm2047_vm15, %v2064_v63, %v3460_v62  ;;  %v2067_v0 = vsel %vm2047_vm15, %v2065_v9, %v3461_v46 }
 0x281   : > { %v2071_v2 = vpack.c.bf16 %v2067_v0, %v2066_v40  ;;  %3345 = vmatprep.subr.bf16.mxu1 %v3742_v7 }
 0x283   : > { %2408 = vmatprep.mubr.bf16.mxu1 %v2071_v2 }
 0x284   : > { %2409 = vmatmul.mubr.bf16.vlgmr.msra.gmra.mrb[68].mxu1 %v2070_v57 }
 0x285   : > { %3346 = vmatpush3.bf16.msra.mxu1 %v3647_v8  ;;  %3353 = vmatprep.mubr.msk.bf16.mxu1 %vm3743_vm5, %v3742_v7 }
 0x286   : > { %3347 = vmatprep.subr.bf16.mxu1 %v3742_v7 }
 0x289   : > { %3348 = vmatpush3.bf16.msra.mxu1 %v3648_v49 }
 0x28a   : > { %3349 = vmatprep.subr.bf16.mxu1 %v3742_v7 }
 0x28d   : > { %3350 = vmatpush3.bf16.msra.mxu1 %v3649_v21 }
 0x28e   : > { %3351 = vmatprep.subr.bf16.mxu1 %v3742_v7 }
 0x291   : > { %3352 = vmatpush3.bf16.msra.mxu1 %v3650_v61 }
 0x336   : > { %v3272_v15 = vpop.f32.mrb[64].mxu1 }
 0x337   : > { %v3273_v54 = vpop.f32.mrb[65].mxu1 }
 0x338   : > { %v3274_v38 = vadd.f32 %v3273_v54, %v3272_v15  ;;  %v3275_v41 = vpop.f32.mrb[66].mxu1 }
 0x339   : > { %v3276_v47 = vpop.f32.mrb[67].mxu1 }
 0x33a   : > { %v3277_v18 = vadd.f32 %v3276_v47, %v3275_v41  ;;  %v2370_v26 = vadd.f32 %v3274_v38, %v2949_v20 }
 0x33c   : > { %v2373_v22 = vadd.f32 %v3277_v18, %v2949_v20 }
 0x357   : > { %v3294_v16 = vpop.f32.mrb[68].mxu1 }
 0x358   : > { %v3295_v25 = vpop.f32.mrb[69].mxu1 }
 0x359   : > { %v3296_v59 = vadd.f32 %v3295_v25, %v3294_v16  ;;  %v3297_v28 = vpop.f32.mrb[70].mxu1 }
 0x35a   : > { %v3298_v19 = vpop.f32.mrb[71].mxu1 }
 0x35b   : > { %v2411_v3 = vadd.f32 %v3296_v59, %v2370_v26  ;;  %v3299_v17 = vadd.f32 %v3298_v19, %v3297_v28 }
 0x35d   : > { %v2419_v30 = vmul.f32 0.01, %v2411_v3  ;;  %v2414_v24 = vadd.f32 %v3299_v17, %v2373_v22  ;;  %vm2417_vm6 = vcmp.ge.f32.partialorder %v2411_v3, 0.0 }
 0x35f   : > { %vm2418_vm7 = vcmp.ge.f32.partialorder %v2414_v24, 0.0  ;;  %v2420_v57 = vmul.f32 0.01, %v2414_v24  ;;  %v2421_v23 = vsel %vm2417_vm6, %v2411_v3, %v2419_v30 }
 0x361   : > { %v2422_v31 = vsel %vm2418_vm7, %v2414_v24, %v2420_v57 }
 0x362   : > { %v2423_v33 = vpack.c.bf16 %v2422_v31, %v2421_v23 }
 0x364   : > { %3354 = vmatmul.mubr.msk.bf16.vlgmr.msra.gmra.mrb[72].mxu1 %vm1318_vm0, %v2423_v33 }
 0x437   : > { %v2500_v42 = vpop.f32.mrb[72].mxu1 }
 0x438   : > { %v2501_v45 = vadd.f32 %v2982_v39, %v2500_v42  ;;  %v3355_v48 = vpop.f32.mrb[73].mxu1 }
 0x439   : > { %v2503_v1 = vpop.f32.mrb[74].mxu1 }
 0x43a   : > { %v2509_v34 = vmul.f32 0.01, %v2501_v45  ;;  %v2504_v50 = vadd.f32 %v2982_v39, %v2503_v1  ;;  %v3356_v52 = vpop.f32.mrb[75].mxu1  ;;  %vm2507_vm0 = vcmp.ge.f32.partialorder %v2501_v45, 0.0 }
 0x43c   : > { %vm2508_vm8 = vcmp.ge.f32.partialorder %v2504_v50, 0.0  ;;  %v2510_v5 = vmul.f32 0.01, %v2504_v50  ;;  %v2511_v58 = vsel %vm2507_vm0, %v2501_v45, %v2509_v34 }
 0x43e   : > { %v2512_v44 = vsel %vm2508_vm8, %v2504_v50, %v2510_v5 }
 0x43f   : > { %v2513_v53 = vpack.c.bf16 %v2512_v44, %v2511_v58 }
 0x441   : > { %2643 = vmatmul.mubr.bf16.vlgmr.msra.gmra.mrb[96].mxu0 %v2513_v53 }
 0x514   : > { %v2644_v56 = vpop.f32.mrb[96].mxu0 }
 0x515   : > { %2653 = vst [vmem:[%s523_s23] sm:$0xff] %v2644_v56  ;;  %v2646_v46 = vpop.f32.mrb[97].mxu0 }
 0x516   : > { %2654 = vst [vmem:[%s523_s23 + $0x8] sm:$0xff] %v2646_v46  ;;  %v2648_v62 = vpop.f32.mrb[98].mxu0 }
 0x517   : > { %2655 = vst [vmem:[%s523_s23 + $0x10] sm:$0xff] %v2648_v62  ;;  %v2650_v63 = vpop.f32.mrb[99].mxu0 }
 0x518   : > { %2656 = vst [vmem:[%s523_s23 + $0x18] sm:$0xff] %v2650_v63 }
 0x519   : > { %3688 = shalt.err (!%p3685_p5)
}
 0x51a   : > { %s3689_s12 = scalar_lea.hbm %s4645_s22, 512  ;;  %s3693_s19 = scalar_lea.hbm %s4697_s8, 1024 }
 0x51b   : > { %p3690_p7 = scmp.ne.s32.totalorder %s4645_s22, %s3689_s12  ;;  %p3694_p12 = scmp.lt.u32.totalorder %s4645_s22, %s4697_s8 }
 0x51c   : > { %p3695_p13 = scmp.lt.u32.totalorder %s3693_s19, %s3689_s12  ;;  %p3697_p1 = scmp.lt.u32.totalorder %s3689_s12, %s4645_s22 }
 0x51d   : > { %p3691_p10 = pnand %p3690_p7, %p3831_p6 }
 0x51e   : > { %p3696_p0 = por %p3695_p13, %p3694_p12 }
 0x51f   : > { %p3692_p11 = pneg %p3691_p10 }
 0x520   : > { %p3698_p2 = por %p3697_p1, %p3696_p0 }
 0x522   : > { %p3699_p3 = pnand %p3698_p2, %p3692_p11 }
 0x524   : > { %3702 = shalt.err (!%p3699_p3)
}
 0x525   : > { %s3746_s9 = smov 256   ;;  %s3747_s26 = smov 16  }
 0x526   : > { %3360 = dma.vmem_to_hbm [thread:$0]  (%p3831_p6), %s4640_s18, 512, %s4645_s22, %s2658_s24, %s3746_s9, %s3746_s9, %s3747_s26  }
 0x527 PF: > { %s2687_s25 = sand.u32 1, %s3725_s27   ;;  %p3363_p4 = pnand %p2746_p9, %p3835_p8 }
 0x528   : > { %s2688_s10 = scalar_lea.sflag [#allocation4], %s2687_s25 }
 0x529   : > { %3720 = dma.done.wait (!%p3363_p4), %s2688_s10, 512  }
 0x52a   : > { %3722 = vsyncadd (!%p3363_p4), %s2688_s10, 4294966784  ;;  %p18_p5 = scmp.ge.s32.totalorder %s3816_s11, 4   ;;  %s4700_s27 = smov %s3729_s28 }
 0x52b   : > { %s4701_s28 = smov %s3733_s29  ;;  %s4702_s29 = smov %s3829_s14 }
 0x52c   : > { %s4703_s30 = smov %s3816_s11  ;;  %20 = sbr.rel (!%p18_p5) target bundleno = 3 (0x3), region = 124 }
 0x533   :  { %2693 = vsyncpa [#allocation4], 1 }
 0x534   :  { %2695 = vsyncpa [#allocation4 + $0x1], 1 }

</bundles_post_ra>
